<compile_context>
chip_gen: v7x
topology: tpu7x:2x2x1
jax: 0.10.0
libtpu: 0.0.40
codegen_flags: <defaults>
</compile_context>

<pallas_src>
import functools

import jax
import jax.numpy as jnp
from jax.experimental import pallas as pl
from jax.experimental.pallas import tpu as pltpu

C_OUT = 36
KH = KW = 3


def _conv_kernel(x_ref, w_ref, b_ref, o_ref, *, img_w):
    # x_ref: (N, H*W + KW-1)   flattened input planes (+KW-1 pad so every tap slice fits)
    # w_ref: (KH*KW, C_OUT, 1) one (C_OUT, 1) weight column per tap
    # b_ref: (C_OUT, 1)
    # o_ref: (N, C_OUT, OH*W)  "strided" flat spatial: column index = i*W + j
    n, _, span = o_ref.shape

    # Bias-initialised accumulator: channels on sublanes, flat spatial on lanes.
    acc = jnp.broadcast_to(b_ref[...][None], (n, C_OUT, span)).astype(jnp.float32)

    # 9 shifted-plane MACs on the VPU. Each tap is a contiguous static slice of the
    # flattened input (no reshape / relayout inside the kernel). Static Python loop
    # -> fully unrolled at trace time, LLO scheduler sees everything.
    for k in range(KH * KW):
        ky, kx = divmod(k, KW)
        base = ky * img_w + kx                        # static offset
        patch = x_ref[:, base:base + span]            # (N, span), contiguous slice
        w_k = w_ref[k]                                # (C_OUT, 1)
        acc = acc + patch[:, None, :] * w_k[None]     # (N, C_OUT, span)

    o_ref[...] = acc.astype(o_ref.dtype)


def net_forward(x_nchw, weight_oihw, bias):
    """Forward of Net: Conv2d(1, 36, 3, stride=1, padding=0). NCHW in, NCHW out."""
    n, cin, h, w = x_nchw.shape
    assert cin == 1
    oh, ow = h - KH + 1, w - KW + 1
    span = oh * w                       # lane-dense strided spatial extent
    hw_pad = h * w + (KW - 1)           # ensures base + span <= hw_pad for every tap

    # Wrapper-side layout plumbing (cheap reshapes / tiny pad, no HBM transpose of data).
    x_flat = jnp.pad(x_nchw.reshape(n, h * w).astype(jnp.float32),
                     ((0, 0), (0, KW - 1)))                               # (N, H*W+2)
    w_taps = (weight_oihw.reshape(C_OUT, KH * KW).T
              .reshape(KH * KW, C_OUT, 1).astype(jnp.float32))            # (9, 36, 1)
    b2d = bias.reshape(C_OUT, 1).astype(jnp.float32)                      # (36, 1)

    kernel = functools.partial(_conv_kernel, img_w=w)

    out_strided = pl.pallas_call(
        kernel,
        out_shape=jax.ShapeDtypeStruct((n, C_OUT, span), jnp.float32),
        grid_spec=pltpu.PrefetchScalarGridSpec(
            num_scalar_prefetch=0,
            grid=(1,),  # whole (tiny) problem in one step -> no per-step overhead
            in_specs=[
                pl.BlockSpec((n, hw_pad), lambda i: (0, 0)),
                pl.BlockSpec((KH * KW, C_OUT, 1), lambda i: (0, 0, 0)),
                pl.BlockSpec((C_OUT, 1), lambda i: (0, 0)),
            ],
            out_specs=pl.BlockSpec((n, C_OUT, span), lambda i: (0, 0, 0)),
        ),
        compiler_params=pltpu.CompilerParams(
            dimension_semantics=("arbitrary",)),
    )(x_flat, w_taps, b2d)

    # (N, C_OUT, OH*W) -> (N, C_OUT, OH, W) is a free row-major reshape; then trim the
    # KW-1 garbage columns. This replaces a full NHWC->NCHW HBM transpose.
    return out_strided.reshape(n, C_OUT, oh, w)[:, :, :, :ow]


def _reference_conv(x_nchw, weight_oihw, bias):
    out = jax.lax.conv_general_dilated(
        x_nchw, weight_oihw,
        window_strides=(1, 1), padding="VALID",
        dimension_numbers=("NCHW", "OIHW", "NCHW"))
    return out + bias.reshape(1, C_OUT, 1, 1)


if __name__ == "__main__":
    key = jax.random.PRNGKey(0)
    kx, kw, kb = jax.random.split(key, 3)

    # Small shapes consistent with the module: N=2, C_in=1, H=W=16 -> output (2, 36, 14, 14).
    x = jax.random.normal(kx, (2, 1, 16, 16), dtype=jnp.float32)

    # Deterministic Kaiming-uniform-like init, as in nn.Conv2d.
    fan_in = 1 * KH * KW
    bound = 1.0 / (fan_in ** 0.5)
    weight = jax.random.uniform(kw, (C_OUT, 1, KH, KW), jnp.float32,
                                minval=-bound, maxval=bound)
    bias = jax.random.uniform(kb, (C_OUT,), jnp.float32,
                              minval=-bound, maxval=bound)

    out = net_forward(x, weight, bias)
    out = jax.block_until_ready(out)

    ref = _reference_conv(x, weight, bias)
    assert out.shape == (2, C_OUT, 14, 14), out.shape
    assert jnp.allclose(out, ref, atol=1e-5, rtol=1e-5), "mismatch vs reference"

    print("KERNEL_OK")
</pallas_src>

<mosaic_0001>
module attributes {stable_mosaic.version = 11 : i64} {
  func.func @_conv_kernel(%arg0: i32, %arg1: memref<2x258xf32, #tpu.memory_space<vmem>>, %arg2: memref<9x36x1xf32, #tpu.memory_space<vmem>>, %arg3: memref<36x1xf32, #tpu.memory_space<vmem>>, %arg4: memref<2x36x224xf32, #tpu.memory_space<vmem>>) attributes {dimension_semantics = [#tpu.dimension_semantics<arbitrary>], iteration_bounds = array<i64: 1>, scalar_prefetch = 0 : i64, scratch_operands = 0 : i64, tpu.core_type = #tpu.core_type<tc>, window_params = [{pipeline_mode = #tpu.pipeline_mode<synchronous>, transform_indices = @transform_0, window_bounds = array<i64: 2, 258>}, {pipeline_mode = #tpu.pipeline_mode<synchronous>, transform_indices = @transform_1, window_bounds = array<i64: 9, 36, 1>}, {pipeline_mode = #tpu.pipeline_mode<synchronous>, transform_indices = @transform_2, window_bounds = array<i64: 36, 1>}, {pipeline_mode = #tpu.pipeline_mode<synchronous>, transform_indices = @transform_3, window_bounds = array<i64: 2, 36, 224>}]} {
    %c0 = arith.constant 0 : index
    %c0_0 = arith.constant 0 : index
    %0 = vector.load %arg3[%c0, %c0_0] : memref<36x1xf32, #tpu.memory_space<vmem>>, vector<36x1xf32>
    %1 = vector.shape_cast %0 : vector<36x1xf32> to vector<1x36x1xf32>
    %2 = vector.shape_cast %1 : vector<1x36x1xf32> to vector<1x36x1xf32>
    %3 = vector.broadcast %2 : vector<1x36x1xf32> to vector<2x36x224xf32>
    %c0_1 = arith.constant 0 : index
    %c0_2 = arith.constant 0 : index
    %4 = vector.load %arg1[%c0_1, %c0_2] : memref<2x258xf32, #tpu.memory_space<vmem>>, vector<2x224xf32>
    %c0_3 = arith.constant 0 : index
    %c0_4 = arith.constant 0 : index
    %c0_5 = arith.constant 0 : index
    %5 = vector.load %arg2[%c0_3, %c0_4, %c0_5] : memref<9x36x1xf32, #tpu.memory_space<vmem>>, vector<1x36x1xf32>
    %6 = vector.shape_cast %5 : vector<1x36x1xf32> to vector<36x1xf32>
    %7 = vector.shape_cast %4 : vector<2x224xf32> to vector<2x1x224xf32>
    %8 = vector.shape_cast %6 : vector<36x1xf32> to vector<1x36x1xf32>
    %9 = vector.broadcast %7 : vector<2x1x224xf32> to vector<2x36x224xf32>
    %10 = vector.broadcast %8 : vector<1x36x1xf32> to vector<2x36x224xf32>
    %11 = arith.mulf %9, %10 : vector<2x36x224xf32>
    %12 = arith.addf %3, %11 : vector<2x36x224xf32>
    %c0_6 = arith.constant 0 : index
    %c1 = arith.constant 1 : index
    %13 = vector.load %arg1[%c0_6, %c1] : memref<2x258xf32, #tpu.memory_space<vmem>>, vector<2x224xf32>
    %c1_7 = arith.constant 1 : index
    %c0_8 = arith.constant 0 : index
    %c0_9 = arith.constant 0 : index
    %14 = vector.load %arg2[%c1_7, %c0_8, %c0_9] : memref<9x36x1xf32, #tpu.memory_space<vmem>>, vector<1x36x1xf32>
    %15 = vector.shape_cast %14 : vector<1x36x1xf32> to vector<36x1xf32>
    %16 = vector.shape_cast %13 : vector<2x224xf32> to vector<2x1x224xf32>
    %17 = vector.shape_cast %15 : vector<36x1xf32> to vector<1x36x1xf32>
    %18 = vector.broadcast %16 : vector<2x1x224xf32> to vector<2x36x224xf32>
    %19 = vector.broadcast %17 : vector<1x36x1xf32> to vector<2x36x224xf32>
    %20 = arith.mulf %18, %19 : vector<2x36x224xf32>
    %21 = arith.addf %12, %20 : vector<2x36x224xf32>
    %c0_10 = arith.constant 0 : index
    %c2 = arith.constant 2 : index
    %22 = vector.load %arg1[%c0_10, %c2] : memref<2x258xf32, #tpu.memory_space<vmem>>, vector<2x224xf32>
    %c2_11 = arith.constant 2 : index
    %c0_12 = arith.constant 0 : index
    %c0_13 = arith.constant 0 : index
    %23 = vector.load %arg2[%c2_11, %c0_12, %c0_13] : memref<9x36x1xf32, #tpu.memory_space<vmem>>, vector<1x36x1xf32>
    %24 = vector.shape_cast %23 : vector<1x36x1xf32> to vector<36x1xf32>
    %25 = vector.shape_cast %22 : vector<2x224xf32> to vector<2x1x224xf32>
    %26 = vector.shape_cast %24 : vector<36x1xf32> to vector<1x36x1xf32>
    %27 = vector.broadcast %25 : vector<2x1x224xf32> to vector<2x36x224xf32>
    %28 = vector.broadcast %26 : vector<1x36x1xf32> to vector<2x36x224xf32>
    %29 = arith.mulf %27, %28 : vector<2x36x224xf32>
    %30 = arith.addf %21, %29 : vector<2x36x224xf32>
    %c0_14 = arith.constant 0 : index
    %c16 = arith.constant 16 : index
    %31 = vector.load %arg1[%c0_14, %c16] : memref<2x258xf32, #tpu.memory_space<vmem>>, vector<2x224xf32>
    %c3 = arith.constant 3 : index
    %c0_15 = arith.constant 0 : index
    %c0_16 = arith.constant 0 : index
    %32 = vector.load %arg2[%c3, %c0_15, %c0_16] : memref<9x36x1xf32, #tpu.memory_space<vmem>>, vector<1x36x1xf32>
    %33 = vector.shape_cast %32 : vector<1x36x1xf32> to vector<36x1xf32>
    %34 = vector.shape_cast %31 : vector<2x224xf32> to vector<2x1x224xf32>
    %35 = vector.shape_cast %33 : vector<36x1xf32> to vector<1x36x1xf32>
    %36 = vector.broadcast %34 : vector<2x1x224xf32> to vector<2x36x224xf32>
    %37 = vector.broadcast %35 : vector<1x36x1xf32> to vector<2x36x224xf32>
    %38 = arith.mulf %36, %37 : vector<2x36x224xf32>
    %39 = arith.addf %30, %38 : vector<2x36x224xf32>
    %c0_17 = arith.constant 0 : index
    %c17 = arith.constant 17 : index
    %40 = vector.load %arg1[%c0_17, %c17] : memref<2x258xf32, #tpu.memory_space<vmem>>, vector<2x224xf32>
    %c4 = arith.constant 4 : index
    %c0_18 = arith.constant 0 : index
    %c0_19 = arith.constant 0 : index
    %41 = vector.load %arg2[%c4, %c0_18, %c0_19] : memref<9x36x1xf32, #tpu.memory_space<vmem>>, vector<1x36x1xf32>
    %42 = vector.shape_cast %41 : vector<1x36x1xf32> to vector<36x1xf32>
    %43 = vector.shape_cast %40 : vector<2x224xf32> to vector<2x1x224xf32>
    %44 = vector.shape_cast %42 : vector<36x1xf32> to vector<1x36x1xf32>
    %45 = vector.broadcast %43 : vector<2x1x224xf32> to vector<2x36x224xf32>
    %46 = vector.broadcast %44 : vector<1x36x1xf32> to vector<2x36x224xf32>
    %47 = arith.mulf %45, %46 : vector<2x36x224xf32>
    %48 = arith.addf %39, %47 : vector<2x36x224xf32>
    %c0_20 = arith.constant 0 : index
    %c18 = arith.constant 18 : index
    %49 = vector.load %arg1[%c0_20, %c18] : memref<2x258xf32, #tpu.memory_space<vmem>>, vector<2x224xf32>
    %c5 = arith.constant 5 : index
    %c0_21 = arith.constant 0 : index
    %c0_22 = arith.constant 0 : index
    %50 = vector.load %arg2[%c5, %c0_21, %c0_22] : memref<9x36x1xf32, #tpu.memory_space<vmem>>, vector<1x36x1xf32>
    %51 = vector.shape_cast %50 : vector<1x36x1xf32> to vector<36x1xf32>
    %52 = vector.shape_cast %49 : vector<2x224xf32> to vector<2x1x224xf32>
    %53 = vector.shape_cast %51 : vector<36x1xf32> to vector<1x36x1xf32>
    %54 = vector.broadcast %52 : vector<2x1x224xf32> to vector<2x36x224xf32>
    %55 = vector.broadcast %53 : vector<1x36x1xf32> to vector<2x36x224xf32>
    %56 = arith.mulf %54, %55 : vector<2x36x224xf32>
    %57 = arith.addf %48, %56 : vector<2x36x224xf32>
    %c0_23 = arith.constant 0 : index
    %c32 = arith.constant 32 : index
    %58 = vector.load %arg1[%c0_23, %c32] : memref<2x258xf32, #tpu.memory_space<vmem>>, vector<2x224xf32>
    %c6 = arith.constant 6 : index
    %c0_24 = arith.constant 0 : index
    %c0_25 = arith.constant 0 : index
    %59 = vector.load %arg2[%c6, %c0_24, %c0_25] : memref<9x36x1xf32, #tpu.memory_space<vmem>>, vector<1x36x1xf32>
    %60 = vector.shape_cast %59 : vector<1x36x1xf32> to vector<36x1xf32>
    %61 = vector.shape_cast %58 : vector<2x224xf32> to vector<2x1x224xf32>
    %62 = vector.shape_cast %60 : vector<36x1xf32> to vector<1x36x1xf32>
    %63 = vector.broadcast %61 : vector<2x1x224xf32> to vector<2x36x224xf32>
    %64 = vector.broadcast %62 : vector<1x36x1xf32> to vector<2x36x224xf32>
    %65 = arith.mulf %63, %64 : vector<2x36x224xf32>
    %66 = arith.addf %57, %65 : vector<2x36x224xf32>
    %c0_26 = arith.constant 0 : index
    %c33 = arith.constant 33 : index
    %67 = vector.load %arg1[%c0_26, %c33] : memref<2x258xf32, #tpu.memory_space<vmem>>, vector<2x224xf32>
    %c7 = arith.constant 7 : index
    %c0_27 = arith.constant 0 : index
    %c0_28 = arith.constant 0 : index
    %68 = vector.load %arg2[%c7, %c0_27, %c0_28] : memref<9x36x1xf32, #tpu.memory_space<vmem>>, vector<1x36x1xf32>
    %69 = vector.shape_cast %68 : vector<1x36x1xf32> to vector<36x1xf32>
    %70 = vector.shape_cast %67 : vector<2x224xf32> to vector<2x1x224xf32>
    %71 = vector.shape_cast %69 : vector<36x1xf32> to vector<1x36x1xf32>
    %72 = vector.broadcast %70 : vector<2x1x224xf32> to vector<2x36x224xf32>
    %73 = vector.broadcast %71 : vector<1x36x1xf32> to vector<2x36x224xf32>
    %74 = arith.mulf %72, %73 : vector<2x36x224xf32>
    %75 = arith.addf %66, %74 : vector<2x36x224xf32>
    %c0_29 = arith.constant 0 : index
    %c34 = arith.constant 34 : index
    %76 = vector.load %arg1[%c0_29, %c34] : memref<2x258xf32, #tpu.memory_space<vmem>>, vector<2x224xf32>
    %c8 = arith.constant 8 : index
    %c0_30 = arith.constant 0 : index
    %c0_31 = arith.constant 0 : index
    %77 = vector.load %arg2[%c8, %c0_30, %c0_31] : memref<9x36x1xf32, #tpu.memory_space<vmem>>, vector<1x36x1xf32>
    %78 = vector.shape_cast %77 : vector<1x36x1xf32> to vector<36x1xf32>
    %79 = vector.shape_cast %76 : vector<2x224xf32> to vector<2x1x224xf32>
    %80 = vector.shape_cast %78 : vector<36x1xf32> to vector<1x36x1xf32>
    %81 = vector.broadcast %79 : vector<2x1x224xf32> to vector<2x36x224xf32>
    %82 = vector.broadcast %80 : vector<1x36x1xf32> to vector<2x36x224xf32>
    %83 = arith.mulf %81, %82 : vector<2x36x224xf32>
    %84 = arith.addf %75, %83 : vector<2x36x224xf32>
    %c0_32 = arith.constant 0 : index
    %c0_33 = arith.constant 0 : index
    %c0_34 = arith.constant 0 : index
    %85 = vector.load %arg4[%c0_32, %c0_33, %c0_34] : memref<2x36x224xf32, #tpu.memory_space<vmem>>, vector<2x36x224xf32>
    tpu.vector_store %arg4[%c0_32, %c0_33, %c0_34], %84 {strides = array<i32>} : memref<2x36x224xf32, #tpu.memory_space<vmem>>, vector<2x36x224xf32>,
    return
  }
  func.func @transform_0(%arg0: i32) -> (i32, i32) {
    %c0_i32 = arith.constant 0 : i32
    %c0_i32_0 = arith.constant 0 : i32
    %c0_i32_1 = arith.constant 0 : i32
    return %c0_i32, %c0_i32_0 : i32, i32
  }
  func.func @transform_1(%arg0: i32) -> (i32, i32, i32) {
    %c0_i32 = arith.constant 0 : i32
    %c0_i32_0 = arith.constant 0 : i32
    %c0_i32_1 = arith.constant 0 : i32
    %c0_i32_2 = arith.constant 0 : i32
    return %c0_i32, %c0_i32_0, %c0_i32_1 : i32, i32, i32
  }
  func.func @transform_2(%arg0: i32) -> (i32, i32) {
    %c0_i32 = arith.constant 0 : i32
    %c0_i32_0 = arith.constant 0 : i32
    %c0_i32_1 = arith.constant 0 : i32
    return %c0_i32, %c0_i32_0 : i32, i32
  }
  func.func @transform_3(%arg0: i32) -> (i32, i32, i32) {
    %c0_i32 = arith.constant 0 : i32
    %c0_i32_0 = arith.constant 0 : i32
    %c0_i32_1 = arith.constant 0 : i32
    %c0_i32_2 = arith.constant 0 : i32
    return %c0_i32, %c0_i32_0, %c0_i32_1 : i32, i32, i32
  }
}

</mosaic_0001>

<bundles_post_ra>
// kernel: tpu_custom_call.1
= control target key start
LH: loop header
LB: loop body
LE: loop exit
PB: predicated region body
PF: predicated region fallthrough
CT: control target
= control target key end

     0   :  { %v1885_v0 = vmov 0   ;;  %v59_v30 = vlaneseq  ;;  %s1886_s8 = smov 127   ;;  %s1887_s9 = smov 126   ;;  %vm1053_vm0 = vcmask 900096   ;;  %vm1245_vm1 = vcmask 785408   ;;  %s3226_s2 = inlined_call_operand.vmem [shape: f32[36,1], index: 2, kind: input, shape index: {}]   ;;  %s3227_s1 = inlined_call_operand.vmem [shape: f32[9,36,1], index: 1, kind: input, shape index: {}]   ;;  %s3228_s0 = inlined_call_operand.vmem [shape: f32[2,258], index: 0, kind: input, shape index: {}]   ;;  %s3229_s3 = inlined_call_operand.vmem [shape: f32[2,36,224], index: 3, kind: output, shape index: {}]  }
   0x1   :  { %1884 = vset.pattern.permute.xlu1 %v1885_v0  ;;  %1883 = vset.pattern.permute.xlu0 %v1885_v0  ;;  %v16_v1 = vld [vmem:[%s3226_s2 + $0x10] sm:$0xff]  ;;  %v14_v2 = vld [vmem:[%s3226_s2] sm:$0xff]  ;;  %v17_v3 = vld [vmem:[%s3226_s2 + $0x18] sm:$0xff]  ;;  %s1888_s10 = smov 112   ;;  %s1889_s21 = smov 111   ;;  %vm285_vm2 = vcmask 1039360  }
   0x2   :  { %31 = vperm.xlu1 %1884, %v16_v1   ;;  %21 = vperm.xlu0 %1883, %v14_v2   ;;  %v15_v4 = vld [vmem:[%s3226_s2 + $0x8] sm:$0xff]  ;;  %v18_v5 = vld [vmem:[%s3226_s2 + $0x20] sm:$0xf]  ;;  %v47_v8 = vld [vmem:[%s3227_s1 + $0x10] sm:$0xff]  ;;  %v2001_v33 = vshrl.u32 %v59_v30, 7  ;;  %s1890_s4 = smov 110  }
   0x3   :  { %v45_v6 = vld [vmem:[%s3227_s1] sm:$0xff]  ;;  %v46_v7 = vld [vmem:[%s3227_s1 + $0x8] sm:$0xff]  ;;  %v48_v9 = vld [vmem:[%s3227_s1 + $0x18] sm:$0xff]  ;;  %s1891_s17 = smov 96   ;;  %vm477_vm3 = vcmask 1031168   ;;  %vm669_vm4 = vcmask 916480  }
   0x4   :  { %v49_v10 = vld [vmem:[%s3227_s1 + $0x20] sm:$0xf]  ;;  %v1826_v11 = vld [vmem:[%s3227_s1 + $0x28] sm:$0xff]  ;;  %v1827_v12 = vld [vmem:[%s3227_s1 + $0x30] sm:$0xff]  ;;  %v2008_v36 = vsub.s32 1, %v2001_v33  ;;  %v2011_v37 = vsub.s32 0, %v2001_v33 }
   0x5   :  { %v1828_v13 = vld [vmem:[%s3227_s1 + $0x38] sm:$0xff]  ;;  %v1829_v14 = vld [vmem:[%s3227_s1 + $0x40] sm:$0xff]  ;;  %v1830_v15 = vld [vmem:[%s3227_s1 + $0x48] sm:$0xf]  ;;  %vm861_vm5 = vcmask 908288   ;;  %s1892_s2 = smov 95  }
   0x6   :  { %36 = vperm.xlu1 %1884, %v17_v3   ;;  %26 = vperm.xlu0 %1883, %v15_v4   ;;  %v1832_v16 = vld [vmem:[%s3227_s1 + $0x50] sm:$0xff]  ;;  %v1833_v17 = vld [vmem:[%s3227_s1 + $0x58] sm:$0xff]  ;;  %v1834_v18 = vld [vmem:[%s3227_s1 + $0x60] sm:$0xff]  ;;  %vm1487_vm6 = vcmask 777216   ;;  %vm1739_vm7 = vcmask 769024   ;;  %vm1809_vm8 = vcmask 781312  }
   0x7   :  { %v1835_v19 = vld [vmem:[%s3227_s1 + $0x68] sm:$0xff]  ;;  %v1836_v20 = vld [vmem:[%s3227_s1 + $0x70] sm:$0xf]  ;;  %v1838_v21 = vld [vmem:[%s3227_s1 + $0x78] sm:$0xff] }
   0x8   :  { %v1839_v22 = vld [vmem:[%s3227_s1 + $0x80] sm:$0xff]  ;;  %v1840_v23 = vld [vmem:[%s3227_s1 + $0x88] sm:$0xff]  ;;  %v1841_v24 = vld [vmem:[%s3227_s1 + $0x90] sm:$0xff] }
   0x9   :  { %v1842_v25 = vld [vmem:[%s3227_s1 + $0x98] sm:$0xf]  ;;  %v1831_v40 = vld.sshfl [vmem:[%s3228_s0] sm:$0x33 pattern:$0x75316420] }
   0xa   :  { %41 = vperm.xlu0 %1883, %v18_v5   ;;  %81 = vperm.xlu1 %1884, %v45_v6   ;;  %v2021_v41 = vrot.slane %v1831_v40, %v2008_v36  ;;  %v2024_v42 = vrot.slane %v1831_v40, %v2011_v37  ;;  %v159_v56 = vcombine.high %v1831_v40, %v1831_v40 }
   0xc   :  { %v2047_v59 = vrot.slane %v159_v56, %v2008_v36  ;;  %v2050_v60 = vrot.slane %v159_v56, %v2011_v37 }
   0xe   :  { %86 = vperm.xlu0 %1883, %v46_v7   ;;  %91 = vperm.xlu1 %1884, %v47_v8  }
  0x12   :  { %96 = vperm.xlu0 %1883, %v48_v9   ;;  %101 = vperm.xlu1 %1884, %v49_v10  }
  0x16   :  { %182 = vperm.xlu0 %1883, %v1826_v11   ;;  %187 = vperm.xlu1 %1884, %v1827_v12  }
  0x1a   :  { %192 = vperm.xlu0 %1883, %v1828_v13   ;;  %197 = vperm.xlu1 %1884, %v1829_v14  }
  0x1e   :  { %202 = vperm.xlu0 %1883, %v1830_v15   ;;  %374 = vperm.xlu1 %1884, %v1832_v16  }
  0x22   :  { %379 = vperm.xlu0 %1883, %v1833_v17   ;;  %384 = vperm.xlu1 %1884, %v1834_v18  }
  0x26   :  { %389 = vperm.xlu0 %1883, %v1835_v19   ;;  %394 = vperm.xlu1 %1884, %v1836_v20  }
  0x2a   :  { %566 = vperm.xlu0 %1883, %v1838_v21   ;;  %571 = vperm.xlu1 %1884, %v1839_v22  }
  0x2e   :  { %576 = vperm.xlu0 %1883, %v1840_v23   ;;  %581 = vperm.xlu1 %1884, %v1841_v24  }
  0x32   :  { %586 = vperm.xlu0 %1883, %v1842_v25  }
  0x81   :  { %v1989_v26 = vpop.permute.xlu1 %31  ;;  %v1991_v27 = vpop.permute.xlu0 %21 }
  0x82   :  { %3275 = vst [vmem:[#allocation2_spill] sm:$0xff] %v1989_v26 }
  0x85   :  { %v1993_v28 = vpop.permute.xlu1 %36  ;;  %v1995_v29 = vpop.permute.xlu0 %26 }
  0x89   :  { %v1997_v31 = vpop.permute.xlu0 %41  ;;  %v1999_v32 = vpop.permute.xlu1 %81 }
  0x8d   :  { %v2003_v34 = vpop.permute.xlu0 %86  ;;  %v2005_v35 = vpop.permute.xlu1 %91 }
  0x8e   :  { %3276 = vst [vmem:[#allocation3_spill] sm:$0xff] %v2005_v35 }
  0x91   :  { %v2013_v38 = vpop.permute.xlu0 %96  ;;  %v2015_v39 = vpop.permute.xlu1 %101 }
  0x92   :  { %3277 = vst [vmem:[#allocation4_spill] sm:$0xff] %v2013_v38 }
  0x95   :  { %v183_v43 = vpop.permute.xlu0 %182  ;;  %v188_v46 = vpop.permute.xlu1 %187 }
  0x96   :  { %v206_v44 = vmul.f32 %v183_v43, %v2021_v41  ;;  %v205_v45 = vmul.f32 %v183_v43, %v2024_v42  ;;  %v208_v47 = vmul.f32 %v188_v46, %v2021_v41  ;;  %v207_v48 = vmul.f32 %v188_v46, %v2024_v42 }
  0x97   :  { %v216_v61 = vmul.f32 %v183_v43, %v2047_v59  ;;  %v215_v62 = vmul.f32 %v183_v43, %v2050_v60  ;;  %v218_v63 = vmul.f32 %v188_v46, %v2047_v59  ;;  %v217_v0 = vmul.f32 %v188_v46, %v2050_v60 }
  0x98   :  { %247 = vrot.lane.b32.xlu0 %v206_v44, %s1886_s8  ;;  %245 = vrot.lane.b32.xlu1 %v205_v45, %s1886_s8 }
  0x99   :  { %v193_v49 = vpop.permute.xlu0 %192  ;;  %v198_v52 = vpop.permute.xlu1 %197 }
  0x9a   :  { %v210_v50 = vmul.f32 %v193_v49, %v2021_v41  ;;  %v209_v51 = vmul.f32 %v193_v49, %v2024_v42  ;;  %v212_v53 = vmul.f32 %v198_v52, %v2021_v41  ;;  %v211_v54 = vmul.f32 %v198_v52, %v2024_v42 }
  0x9b   :  { %v220_v1 = vmul.f32 %v193_v49, %v2047_v59  ;;  %v219_v2 = vmul.f32 %v193_v49, %v2050_v60  ;;  %v222_v3 = vmul.f32 %v198_v52, %v2047_v59  ;;  %v221_v4 = vmul.f32 %v198_v52, %v2050_v60 }
  0x9c   :  { %251 = vrot.lane.b32.xlu0 %v208_v47, %s1886_s8  ;;  %249 = vrot.lane.b32.xlu1 %v207_v48, %s1886_s8 }
  0x9d   :  { %v203_v55 = vpop.permute.xlu0 %202  ;;  %v375_v7 = vpop.permute.xlu1 %374 }
  0x9e   :  { %v214_v57 = vmul.f32 %v203_v55, %v2021_v41  ;;  %v213_v58 = vmul.f32 %v203_v55, %v2024_v42  ;;  %v224_v5 = vmul.f32 %v203_v55, %v2047_v59  ;;  %v223_v6 = vmul.f32 %v203_v55, %v2050_v60 }
  0x9f   :  { %v397_v8 = vmul.f32 %v375_v7, %v2024_v42  ;;  %v398_v9 = vmul.f32 %v375_v7, %v2021_v41  ;;  %v407_v22 = vmul.f32 %v375_v7, %v2050_v60  ;;  %v408_v23 = vmul.f32 %v375_v7, %v2047_v59 }
  0xa0   :  { %255 = vrot.lane.b32.xlu0 %v210_v50, %s1886_s8  ;;  %253 = vrot.lane.b32.xlu1 %v209_v51, %s1886_s8 }
  0xa1   :  { %v380_v10 = vpop.permute.xlu0 %379  ;;  %v385_v13 = vpop.permute.xlu1 %384 }
  0xa2   :  { %v399_v11 = vmul.f32 %v380_v10, %v2024_v42  ;;  %v400_v12 = vmul.f32 %v380_v10, %v2021_v41  ;;  %v401_v14 = vmul.f32 %v385_v13, %v2024_v42  ;;  %v402_v15 = vmul.f32 %v385_v13, %v2021_v41 }
  0xa3   :  { %v409_v24 = vmul.f32 %v380_v10, %v2050_v60  ;;  %v410_v25 = vmul.f32 %v380_v10, %v2047_v59  ;;  %v411_v30 = vmul.f32 %v385_v13, %v2050_v60  ;;  %v412_v40 = vmul.f32 %v385_v13, %v2047_v59  ;;  %v1844_v13 = vld [vmem:[%s3227_s1 + $0xa0] sm:$0xff] }
  0xa4   :  { %259 = vrot.lane.b32.xlu0 %v212_v53, %s1886_s8  ;;  %257 = vrot.lane.b32.xlu1 %v211_v54, %s1886_s8 }
  0xa5   :  { %v390_v16 = vpop.permute.xlu0 %389  ;;  %v395_v19 = vpop.permute.xlu1 %394 }
  0xa6   :  { %v403_v17 = vmul.f32 %v390_v16, %v2024_v42  ;;  %v404_v18 = vmul.f32 %v390_v16, %v2021_v41  ;;  %v405_v20 = vmul.f32 %v395_v19, %v2024_v42  ;;  %v406_v21 = vmul.f32 %v395_v19, %v2021_v41 }
  0xa7   :  { %v413_v43 = vmul.f32 %v390_v16, %v2050_v60  ;;  %v414_v44 = vmul.f32 %v390_v16, %v2047_v59  ;;  %v415_v45 = vmul.f32 %v395_v19, %v2050_v60  ;;  %v416_v46 = vmul.f32 %v395_v19, %v2047_v59  ;;  %v1847_v16 = vld [vmem:[%s3227_s1 + $0xb8] sm:$0xff] }
  0xa8   :  { %263 = vrot.lane.b32.xlu0 %v214_v57, %s1886_s8  ;;  %261 = vrot.lane.b32.xlu1 %v213_v58, %s1886_s8 }
  0xa9   :  { %v567_v47 = vpop.permute.xlu0 %566  ;;  %v572_v50 = vpop.permute.xlu1 %571 }
  0xaa   :  { %v590_v48 = vmul.f32 %v567_v47, %v2021_v41  ;;  %v589_v49 = vmul.f32 %v567_v47, %v2024_v42  ;;  %v592_v51 = vmul.f32 %v572_v50, %v2021_v41  ;;  %v591_v52 = vmul.f32 %v572_v50, %v2024_v42 }
  0xac   :  { %267 = vrot.lane.b32.xlu0 %v216_v61, %s1886_s8  ;;  %265 = vrot.lane.b32.xlu1 %v215_v62, %s1886_s8 }
  0xad   :  { %v577_v53 = vpop.permute.xlu0 %576  ;;  %v582_v56 = vpop.permute.xlu1 %581 }
  0xae   :  { %v594_v54 = vmul.f32 %v577_v53, %v2021_v41  ;;  %v593_v55 = vmul.f32 %v577_v53, %v2024_v42  ;;  %v596_v57 = vmul.f32 %v582_v56, %v2021_v41  ;;  %v595_v58 = vmul.f32 %v582_v56, %v2024_v42 }
  0xaf   :  { %v605_v7 = vmul.f32 %v582_v56, %v2050_v60 }
  0xb0   :  { %271 = vrot.lane.b32.xlu0 %v218_v63, %s1886_s8  ;;  %269 = vrot.lane.b32.xlu1 %v217_v0, %s1886_s8  ;;  %v600_v0 = vmul.f32 %v567_v47, %v2047_v59 }
  0xb1   :  { %v587_v61 = vpop.permute.xlu0 %586 }
  0xb2   :  { %v598_v62 = vmul.f32 %v587_v61, %v2021_v41  ;;  %v597_v63 = vmul.f32 %v587_v61, %v2024_v42  ;;  %v608_v10 = vmul.f32 %v587_v61, %v2047_v59 }
  0xb4   :  { %275 = vrot.lane.b32.xlu0 %v220_v1, %s1886_s8  ;;  %273 = vrot.lane.b32.xlu1 %v219_v2, %s1886_s8  ;;  %v599_v1 = vmul.f32 %v567_v47, %v2050_v60  ;;  %v602_v2 = vmul.f32 %v572_v50, %v2047_v59 }
  0xb8   :  { %279 = vrot.lane.b32.xlu0 %v222_v3, %s1886_s8  ;;  %277 = vrot.lane.b32.xlu1 %v221_v4, %s1886_s8  ;;  %v601_v3 = vmul.f32 %v572_v50, %v2050_v60  ;;  %v604_v4 = vmul.f32 %v577_v53, %v2047_v59 }
  0xbc   :  { %283 = vrot.lane.b32.xlu0 %v224_v5, %s1886_s8  ;;  %281 = vrot.lane.b32.xlu1 %v223_v6, %s1886_s8  ;;  %v603_v5 = vmul.f32 %v577_v53, %v2050_v60  ;;  %v606_v6 = vmul.f32 %v582_v56, %v2047_v59 }
  0xc0   :  { %437 = vrot.lane.b32.xlu0 %v397_v8, %s1887_s9  ;;  %439 = vrot.lane.b32.xlu1 %v398_v9, %s1887_s9 }
  0xc4   :  { %441 = vrot.lane.b32.xlu0 %v399_v11, %s1887_s9  ;;  %443 = vrot.lane.b32.xlu1 %v400_v12, %s1887_s9  ;;  %v607_v11 = vmul.f32 %v587_v61, %v2050_v60  ;;  %v1845_v12 = vld [vmem:[%s3227_s1 + $0xa8] sm:$0xff] }
  0xc8   :  { %445 = vrot.lane.b32.xlu0 %v401_v14, %s1887_s9  ;;  %447 = vrot.lane.b32.xlu1 %v402_v15, %s1887_s9 }
  0xcc   :  { %449 = vrot.lane.b32.xlu0 %v403_v17, %s1887_s9  ;;  %451 = vrot.lane.b32.xlu1 %v404_v18, %s1887_s9  ;;  %v1846_v17 = vld [vmem:[%s3227_s1 + $0xb0] sm:$0xff] }
  0xd0   :  { %453 = vrot.lane.b32.xlu0 %v405_v20, %s1887_s9  ;;  %455 = vrot.lane.b32.xlu1 %v406_v21, %s1887_s9  ;;  %v1848_v20 = vld [vmem:[%s3227_s1 + $0xc0] sm:$0xf] }
  0xd4   :  { %457 = vrot.lane.b32.xlu0 %v407_v22, %s1887_s9  ;;  %459 = vrot.lane.b32.xlu1 %v408_v23, %s1887_s9 }
  0xd8   :  { %461 = vrot.lane.b32.xlu0 %v409_v24, %s1887_s9  ;;  %463 = vrot.lane.b32.xlu1 %v410_v25, %s1887_s9 }
  0xdc   :  { %465 = vrot.lane.b32.xlu0 %v411_v30, %s1887_s9  ;;  %467 = vrot.lane.b32.xlu1 %v412_v40, %s1887_s9 }
  0xe0   :  { %469 = vrot.lane.b32.xlu0 %v413_v43, %s1887_s9  ;;  %471 = vrot.lane.b32.xlu1 %v414_v44, %s1887_s9 }
  0xe4   :  { %473 = vrot.lane.b32.xlu0 %v415_v45, %s1887_s9  ;;  %475 = vrot.lane.b32.xlu1 %v416_v46, %s1887_s9 }
  0xe8   :  { %631 = vrot.lane.b32.xlu0 %v590_v48, %s1888_s10  ;;  %629 = vrot.lane.b32.xlu1 %v589_v49, %s1888_s10 }
  0xec   :  { %635 = vrot.lane.b32.xlu0 %v592_v51, %s1888_s10  ;;  %633 = vrot.lane.b32.xlu1 %v591_v52, %s1888_s10 }
  0xf0   :  { %639 = vrot.lane.b32.xlu0 %v594_v54, %s1888_s10  ;;  %637 = vrot.lane.b32.xlu1 %v593_v55, %s1888_s10 }
  0xf4   :  { %643 = vrot.lane.b32.xlu0 %v596_v57, %s1888_s10  ;;  %641 = vrot.lane.b32.xlu1 %v595_v58, %s1888_s10 }
  0xf8   :  { %647 = vrot.lane.b32.xlu0 %v598_v62, %s1888_s10  ;;  %645 = vrot.lane.b32.xlu1 %v597_v63, %s1888_s10 }
  0xfc   :  { %651 = vrot.lane.b32.xlu0 %v600_v0, %s1888_s10  ;;  %649 = vrot.lane.b32.xlu1 %v599_v1, %s1888_s10 }
 0x100   :  { %655 = vrot.lane.b32.xlu0 %v602_v2, %s1888_s10  ;;  %653 = vrot.lane.b32.xlu1 %v601_v3, %s1888_s10 }
 0x104   :  { %659 = vrot.lane.b32.xlu0 %v604_v4, %s1888_s10  ;;  %657 = vrot.lane.b32.xlu1 %v603_v5, %s1888_s10 }
 0x108   :  { %663 = vrot.lane.b32.xlu0 %v606_v6, %s1888_s10  ;;  %661 = vrot.lane.b32.xlu1 %v605_v7, %s1888_s10 }
 0x10a   :  { %v2148_v8 = vpop.permute.xlu0 %247  ;;  %v2150_v9 = vpop.permute.xlu1 %245 }
 0x10c   :  { %667 = vrot.lane.b32.xlu0 %v608_v10, %s1888_s10  ;;  %665 = vrot.lane.b32.xlu1 %v607_v11, %s1888_s10 }
 0x10e   :  { %v2162_v14 = vpop.permute.xlu0 %251  ;;  %v2164_v15 = vpop.permute.xlu1 %249 }
 0x110   :  { %763 = vperm.xlu0 %1883, %v1845_v12   ;;  %758 = vperm.xlu1 %1884, %v1844_v13  }
 0x112   :  { %v2172_v18 = vpop.permute.xlu0 %255  ;;  %v2174_v19 = vpop.permute.xlu1 %253 }
 0x113   :  { %3278 = vst [vmem:[#allocation5_spill] sm:$0xff] %v2172_v18  ;;  %3279 = vst [vmem:[#allocation6_spill] sm:$0xff] %v2174_v19 }
 0x114   :  { %773 = vperm.xlu0 %1883, %v1847_v16   ;;  %768 = vperm.xlu1 %1884, %v1846_v17  }
 0x116   :  { %v2179_v21 = vpop.permute.xlu0 %259  ;;  %v2181_v22 = vpop.permute.xlu1 %257 }
 0x117   :  { %3280 = vst [vmem:[#allocation7_spill] sm:$0xff] %v2179_v21  ;;  %3281 = vst [vmem:[#allocation8_spill] sm:$0xff] %v2181_v22 }
 0x118   :  { %778 = vperm.xlu1 %1884, %v1848_v20  }
 0x11a   :  { %v2183_v23 = vpop.permute.xlu0 %263  ;;  %v2185_v24 = vpop.permute.xlu1 %261 }
 0x11b   :  { %3282 = vst [vmem:[#allocation9_spill] sm:$0xff] %v2183_v23  ;;  %3283 = vst [vmem:[#allocation10_spill] sm:$0xff] %v2185_v24 }
 0x11e   :  { %v2187_v25 = vpop.permute.xlu0 %267  ;;  %v2189_v30 = vpop.permute.xlu1 %265 }
 0x11f   :  { %3284 = vst [vmem:[#allocation11_spill] sm:$0xff] %v2187_v25  ;;  %3285 = vst [vmem:[#allocation12_spill] sm:$0xff] %v2189_v30 }
 0x122   :  { %v2191_v40 = vpop.permute.xlu0 %271  ;;  %v2193_v43 = vpop.permute.xlu1 %269 }
 0x123   :  { %3286 = vst [vmem:[#allocation13_spill] sm:$0xff] %v2191_v40  ;;  %3287 = vst [vmem:[#allocation14_spill] sm:$0xff] %v2193_v43 }
 0x126   :  { %v2195_v44 = vpop.permute.xlu0 %275  ;;  %v2197_v45 = vpop.permute.xlu1 %273 }
 0x127   :  { %3288 = vst [vmem:[#allocation15_spill] sm:$0xff] %v2195_v44  ;;  %3289 = vst [vmem:[#allocation16_spill] sm:$0xff] %v2197_v45 }
 0x12a   :  { %v2199_v46 = vpop.permute.xlu0 %279  ;;  %v2201_v47 = vpop.permute.xlu1 %277 }
 0x12e   :  { %v2203_v48 = vpop.permute.xlu0 %283  ;;  %v2205_v49 = vpop.permute.xlu1 %281 }
 0x132   :  { %v2207_v50 = vpop.permute.xlu0 %437  ;;  %v2209_v51 = vpop.permute.xlu1 %439 }
 0x136   :  { %v2211_v52 = vpop.permute.xlu0 %441  ;;  %v2213_v53 = vpop.permute.xlu1 %443 }
 0x137   :  { %3290 = vst [vmem:[#allocation17_spill] sm:$0xff] %v2211_v52  ;;  %3291 = vst [vmem:[#allocation18_spill] sm:$0xff] %v2213_v53 }
 0x13a   :  { %v2215_v54 = vpop.permute.xlu0 %445  ;;  %v2217_v55 = vpop.permute.xlu1 %447 }
 0x13b   :  { %3292 = vst [vmem:[#allocation19_spill] sm:$0xff] %v2215_v54  ;;  %3293 = vst [vmem:[#allocation20_spill] sm:$0xff] %v2217_v55 }
 0x13e   :  { %v2219_v56 = vpop.permute.xlu0 %449  ;;  %v2221_v57 = vpop.permute.xlu1 %451 }
 0x13f   :  { %3294 = vst [vmem:[#allocation21_spill] sm:$0xff] %v2219_v56  ;;  %3295 = vst [vmem:[#allocation22_spill] sm:$0xff] %v2221_v57 }
 0x142   :  { %v2223_v58 = vpop.permute.xlu0 %453  ;;  %v2225_v61 = vpop.permute.xlu1 %455 }
 0x143   :  { %3296 = vst [vmem:[#allocation23_spill] sm:$0xff] %v2223_v58  ;;  %3297 = vst [vmem:[#allocation24_spill] sm:$0xff] %v2225_v61 }
 0x146   :  { %v2227_v62 = vpop.permute.xlu0 %457  ;;  %v2229_v63 = vpop.permute.xlu1 %459 }
 0x147   :  { %3298 = vst [vmem:[#allocation25_spill] sm:$0xff] %v2227_v62  ;;  %3299 = vst [vmem:[#allocation26_spill] sm:$0xff] %v2229_v63 }
 0x14a   :  { %v2231_v0 = vpop.permute.xlu0 %461  ;;  %v2233_v1 = vpop.permute.xlu1 %463 }
 0x14b   :  { %3300 = vst [vmem:[#allocation27_spill] sm:$0xff] %v2231_v0  ;;  %3301 = vst [vmem:[#allocation28_spill] sm:$0xff] %v2233_v1 }
 0x14e   :  { %v2235_v2 = vpop.permute.xlu0 %465  ;;  %v2237_v3 = vpop.permute.xlu1 %467 }
 0x14f   :  { %3302 = vst [vmem:[#allocation29_spill] sm:$0xff] %v2235_v2  ;;  %3303 = vst [vmem:[#allocation30_spill] sm:$0xff] %v2237_v3 }
 0x152   :  { %v2239_v4 = vpop.permute.xlu0 %469  ;;  %v2241_v5 = vpop.permute.xlu1 %471 }
 0x156   :  { %v2243_v6 = vpop.permute.xlu0 %473  ;;  %v2245_v7 = vpop.permute.xlu1 %475 }
 0x15a   :  { %v2247_v10 = vpop.permute.xlu0 %631  ;;  %v2249_v11 = vpop.permute.xlu1 %629 }
 0x15e   :  { %v2251_v12 = vpop.permute.xlu0 %635  ;;  %v2253_v13 = vpop.permute.xlu1 %633 }
 0x15f   :  { %3304 = vst [vmem:[#allocation31_spill] sm:$0xff] %v2251_v12  ;;  %3305 = vst [vmem:[#allocation32_spill] sm:$0xff] %v2253_v13 }
 0x162   :  { %v2255_v16 = vpop.permute.xlu1 %637  ;;  %v2257_v17 = vpop.permute.xlu0 %639 }
 0x163   :  { %3306 = vst [vmem:[#allocation33_spill] sm:$0xff] %v2255_v16  ;;  %3307 = vst [vmem:[#allocation34_spill] sm:$0xff] %v2257_v17 }
 0x166   :  { %v2259_v20 = vpop.permute.xlu1 %641  ;;  %v2261_v2 = vpop.permute.xlu0 %643 }
 0x167   :  { %3308 = vst [vmem:[#allocation35_spill] sm:$0xff] %v2259_v20  ;;  %3309 = vst [vmem:[#allocation36_spill] sm:$0xff] %v2261_v2 }
 0x16a   :  { %v2263_v3 = vpop.permute.xlu1 %645  ;;  %v2265_v0 = vpop.permute.xlu0 %647 }
 0x16b   :  { %3310 = vst [vmem:[#allocation37_spill] sm:$0xff] %v2263_v3  ;;  %3311 = vst [vmem:[#allocation38_spill] sm:$0xff] %v2265_v0 }
 0x16e   :  { %v2267_v1 = vpop.permute.xlu1 %649  ;;  %v2269_v45 = vpop.permute.xlu0 %651 }
 0x16f   :  { %3312 = vst [vmem:[#allocation39_spill] sm:$0xff] %v2267_v1  ;;  %3313 = vst [vmem:[#allocation40_spill] sm:$0xff] %v2269_v45 }
 0x172   :  { %v2271_v44 = vpop.permute.xlu1 %653  ;;  %v2273_v62 = vpop.permute.xlu0 %655 }
 0x173   :  { %3314 = vst [vmem:[#allocation41_spill] sm:$0xff] %v2271_v44  ;;  %3315 = vst [vmem:[#allocation42_spill] sm:$0xff] %v2273_v62 }
 0x176   :  { %v2275_v63 = vpop.permute.xlu1 %657  ;;  %v2277_v43 = vpop.permute.xlu0 %659 }
 0x177   :  { %3316 = vst [vmem:[#allocation43_spill] sm:$0xff] %v2275_v63  ;;  %3317 = vst [vmem:[#allocation44_spill] sm:$0xff] %v2277_v43 }
 0x17a   :  { %v2279_v40 = vpop.permute.xlu1 %661  ;;  %v2281_v20 = vpop.permute.xlu0 %663 }
 0x17e   :  { %v2283_v2 = vpop.permute.xlu1 %665  ;;  %v2285_v3 = vpop.permute.xlu0 %667 }
 0x18f   :  { %v759_v0 = vpop.permute.xlu1 %758  ;;  %v764_v44 = vpop.permute.xlu0 %763 }
 0x190   :  { %v782_v1 = vmul.f32 %v759_v0, %v2021_v41  ;;  %v781_v45 = vmul.f32 %v759_v0, %v2024_v42  ;;  %v784_v63 = vmul.f32 %v764_v44, %v2021_v41  ;;  %v783_v43 = vmul.f32 %v764_v44, %v2024_v42 }
 0x192   :  { %823 = vrot.lane.b32.xlu1 %v782_v1, %s1889_s21  ;;  %821 = vrot.lane.b32.xlu0 %v781_v45, %s1889_s21 }
 0x193   :  { %v769_v62 = vpop.permute.xlu1 %768  ;;  %v774_v56 = vpop.permute.xlu0 %773 }
 0x194   :  { %v786_v58 = vmul.f32 %v769_v62, %v2021_v41  ;;  %v785_v61 = vmul.f32 %v769_v62, %v2024_v42  ;;  %v788_v45 = vmul.f32 %v774_v56, %v2021_v41  ;;  %v787_v1 = vmul.f32 %v774_v56, %v2024_v42 }
 0x196   :  { %827 = vrot.lane.b32.xlu1 %v784_v63, %s1889_s21  ;;  %825 = vrot.lane.b32.xlu0 %v783_v43, %s1889_s21 }
 0x197   :  { %v779_v57 = vpop.permute.xlu1 %778 }
 0x198   :  { %v790_v43 = vmul.f32 %v779_v57, %v2021_v41  ;;  %v789_v63 = vmul.f32 %v779_v57, %v2024_v42 }
 0x19a   :  { %831 = vrot.lane.b32.xlu1 %v786_v58, %s1889_s21  ;;  %829 = vrot.lane.b32.xlu0 %v785_v61, %s1889_s21  ;;  %v792_v58 = vmul.f32 %v759_v0, %v2047_v59  ;;  %v791_v61 = vmul.f32 %v759_v0, %v2050_v60  ;;  %v798_v0 = vmul.f32 %v774_v56, %v2047_v59 }
 0x19e   :  { %835 = vrot.lane.b32.xlu1 %v788_v45, %s1889_s21  ;;  %833 = vrot.lane.b32.xlu0 %v787_v1, %s1889_s21  ;;  %v794_v45 = vmul.f32 %v764_v44, %v2047_v59  ;;  %v793_v1 = vmul.f32 %v764_v44, %v2050_v60  ;;  %v800_v44 = vmul.f32 %v779_v57, %v2047_v59 }
 0x1a2   :  { %839 = vrot.lane.b32.xlu1 %v790_v43, %s1889_s21  ;;  %837 = vrot.lane.b32.xlu0 %v789_v63, %s1889_s21  ;;  %v796_v43 = vmul.f32 %v769_v62, %v2047_v59  ;;  %v795_v63 = vmul.f32 %v769_v62, %v2050_v60  ;;  %v1851_v62 = vld [vmem:[%s3227_s1 + $0xd0] sm:$0xff] }
 0x1a6   :  { %843 = vrot.lane.b32.xlu1 %v792_v58, %s1889_s21  ;;  %841 = vrot.lane.b32.xlu0 %v791_v61, %s1889_s21  ;;  %v797_v58 = vmul.f32 %v774_v56, %v2050_v60  ;;  %v799_v61 = vmul.f32 %v779_v57, %v2050_v60  ;;  %v1850_v56 = vld [vmem:[%s3227_s1 + $0xc8] sm:$0xff]  ;;  %v1852_v57 = vld [vmem:[%s3227_s1 + $0xd8] sm:$0xff] }
 0x1aa   :  { %847 = vrot.lane.b32.xlu1 %v794_v45, %s1889_s21  ;;  %845 = vrot.lane.b32.xlu0 %v793_v1, %s1889_s21  ;;  %v1853_v45 = vld [vmem:[%s3227_s1 + $0xe0] sm:$0xff]  ;;  %v1854_v1 = vld [vmem:[%s3227_s1 + $0xe8] sm:$0xf] }
 0x1ae   :  { %851 = vrot.lane.b32.xlu1 %v796_v43, %s1889_s21  ;;  %849 = vrot.lane.b32.xlu0 %v795_v63, %s1889_s21 }
 0x1b2   :  { %855 = vrot.lane.b32.xlu1 %v798_v0, %s1889_s21  ;;  %853 = vrot.lane.b32.xlu0 %v797_v58, %s1889_s21 }
 0x1b6   :  { %859 = vrot.lane.b32.xlu1 %v800_v44, %s1889_s21  ;;  %857 = vrot.lane.b32.xlu0 %v799_v61, %s1889_s21 }
 0x1ba   :  { %955 = vperm.xlu1 %1884, %v1851_v62   ;;  %950 = vperm.xlu0 %1883, %v1850_v56  }
 0x1be   :  { %965 = vperm.xlu1 %1884, %v1853_v45   ;;  %960 = vperm.xlu0 %1883, %v1852_v57  }
 0x1c2   :  { %970 = vperm.xlu0 %1883, %v1854_v1  }
 0x204   :  { %v2342_v43 = vpop.permute.xlu0 %821  ;;  %v2344_v63 = vpop.permute.xlu1 %823 }
 0x208   :  { %v2346_v0 = vpop.permute.xlu0 %825  ;;  %v2348_v58 = vpop.permute.xlu1 %827 }
 0x209   :  { %3318 = vst [vmem:[#allocation45_spill] sm:$0xff] %v2346_v0  ;;  %3319 = vst [vmem:[#allocation46_spill] sm:$0xff] %v2348_v58 }
 0x20c   :  { %v2350_v44 = vpop.permute.xlu0 %829  ;;  %v2352_v61 = vpop.permute.xlu1 %831 }
 0x20d   :  { %3320 = vst [vmem:[#allocation47_spill] sm:$0xff] %v2350_v44  ;;  %3321 = vst [vmem:[#allocation48_spill] sm:$0xff] %v2352_v61 }
 0x210   :  { %v2354_v62 = vpop.permute.xlu0 %833  ;;  %v2356_v56 = vpop.permute.xlu1 %835 }
 0x211   :  { %3322 = vst [vmem:[#allocation49_spill] sm:$0xff] %v2354_v62  ;;  %3323 = vst [vmem:[#allocation50_spill] sm:$0xff] %v2356_v56 }
 0x214   :  { %v2358_v45 = vpop.permute.xlu0 %837  ;;  %v2360_v57 = vpop.permute.xlu1 %839 }
 0x215   :  { %3324 = vst [vmem:[#allocation51_spill] sm:$0xff] %v2358_v45  ;;  %3325 = vst [vmem:[#allocation52_spill] sm:$0xff] %v2360_v57 }
 0x218   :  { %v2362_v1 = vpop.permute.xlu0 %841  ;;  %v2364_v30 = vpop.permute.xlu1 %843 }
 0x219   :  { %3326 = vst [vmem:[#allocation53_spill] sm:$0xff] %v2362_v1  ;;  %3327 = vst [vmem:[#allocation54_spill] sm:$0xff] %v2364_v30 }
 0x21c   :  { %v2366_v25 = vpop.permute.xlu0 %845  ;;  %v2368_v24 = vpop.permute.xlu1 %847 }
 0x21d   :  { %3328 = vst [vmem:[#allocation55_spill] sm:$0xff] %v2366_v25  ;;  %3329 = vst [vmem:[#allocation56_spill] sm:$0xff] %v2368_v24 }
 0x220   :  { %v2370_v23 = vpop.permute.xlu0 %849  ;;  %v2372_v44 = vpop.permute.xlu1 %851 }
 0x221   :  { %3330 = vst [vmem:[#allocation57_spill] sm:$0xff] %v2370_v23  ;;  %3331 = vst [vmem:[#allocation58_spill] sm:$0xff] %v2372_v44 }
 0x224   :  { %v2374_v61 = vpop.permute.xlu0 %853  ;;  %v2376_v62 = vpop.permute.xlu1 %855 }
 0x228   :  { %v2378_v56 = vpop.permute.xlu0 %857  ;;  %v2380_v45 = vpop.permute.xlu1 %859 }
 0x239   :  { %v951_v57 = vpop.permute.xlu0 %950  ;;  %v956_v25 = vpop.permute.xlu1 %955 }
 0x23a   :  { %v974_v1 = vmul.f32 %v951_v57, %v2021_v41  ;;  %v973_v30 = vmul.f32 %v951_v57, %v2024_v42  ;;  %v976_v23 = vmul.f32 %v956_v25, %v2021_v41  ;;  %v975_v44 = vmul.f32 %v956_v25, %v2024_v42 }
 0x23c   :  { %1015 = vrot.lane.b32.xlu0 %v974_v1, %s1890_s4  ;;  %1013 = vrot.lane.b32.xlu1 %v973_v30, %s1890_s4 }
 0x23d   :  { %v961_v24 = vpop.permute.xlu0 %960  ;;  %v966_v16 = vpop.permute.xlu1 %965 }
 0x23e   :  { %v978_v22 = vmul.f32 %v961_v24, %v2021_v41  ;;  %v977_v21 = vmul.f32 %v961_v24, %v2024_v42  ;;  %v980_v30 = vmul.f32 %v966_v16, %v2021_v41  ;;  %v979_v1 = vmul.f32 %v966_v16, %v2024_v42 }
 0x240   :  { %1019 = vrot.lane.b32.xlu0 %v976_v23, %s1890_s4  ;;  %1017 = vrot.lane.b32.xlu1 %v975_v44, %s1890_s4 }
 0x241   :  { %v971_v17 = vpop.permute.xlu0 %970 }
 0x242   :  { %v982_v23 = vmul.f32 %v971_v17, %v2021_v41  ;;  %v981_v44 = vmul.f32 %v971_v17, %v2024_v42 }
 0x244   :  { %1023 = vrot.lane.b32.xlu0 %v978_v22, %s1890_s4  ;;  %1021 = vrot.lane.b32.xlu1 %v977_v21, %s1890_s4  ;;  %v984_v22 = vmul.f32 %v951_v57, %v2047_v59  ;;  %v983_v21 = vmul.f32 %v951_v57, %v2050_v60  ;;  %v990_v57 = vmul.f32 %v966_v16, %v2047_v59 }
 0x248   :  { %1027 = vrot.lane.b32.xlu0 %v980_v30, %s1890_s4  ;;  %1025 = vrot.lane.b32.xlu1 %v979_v1, %s1890_s4  ;;  %v986_v30 = vmul.f32 %v956_v25, %v2047_v59  ;;  %v985_v1 = vmul.f32 %v956_v25, %v2050_v60  ;;  %v992_v25 = vmul.f32 %v971_v17, %v2047_v59 }
 0x24c   :  { %1031 = vrot.lane.b32.xlu0 %v982_v23, %s1890_s4  ;;  %1029 = vrot.lane.b32.xlu1 %v981_v44, %s1890_s4  ;;  %v988_v23 = vmul.f32 %v961_v24, %v2047_v59  ;;  %v987_v44 = vmul.f32 %v961_v24, %v2050_v60  ;;  %v1857_v24 = vld [vmem:[%s3227_s1 + $0xf8] sm:$0xff] }
 0x250   :  { %1035 = vrot.lane.b32.xlu0 %v984_v22, %s1890_s4  ;;  %1033 = vrot.lane.b32.xlu1 %v983_v21, %s1890_s4  ;;  %v989_v22 = vmul.f32 %v966_v16, %v2050_v60  ;;  %v991_v21 = vmul.f32 %v971_v17, %v2050_v60  ;;  %v1856_v16 = vld [vmem:[%s3227_s1 + $0xf0] sm:$0xff]  ;;  %v1858_v17 = vld [vmem:[%s3227_s1 + $0x100] sm:$0xff] }
 0x254   :  { %1039 = vrot.lane.b32.xlu0 %v986_v30, %s1890_s4  ;;  %1037 = vrot.lane.b32.xlu1 %v985_v1, %s1890_s4  ;;  %v1859_v30 = vld [vmem:[%s3227_s1 + $0x108] sm:$0xff]  ;;  %v1860_v1 = vld [vmem:[%s3227_s1 + $0x110] sm:$0xf] }
 0x258   :  { %1043 = vrot.lane.b32.xlu0 %v988_v23, %s1890_s4  ;;  %1041 = vrot.lane.b32.xlu1 %v987_v44, %s1890_s4 }
 0x25c   :  { %1047 = vrot.lane.b32.xlu0 %v990_v57, %s1890_s4  ;;  %1045 = vrot.lane.b32.xlu1 %v989_v22, %s1890_s4 }
 0x260   :  { %1051 = vrot.lane.b32.xlu0 %v992_v25, %s1890_s4  ;;  %1049 = vrot.lane.b32.xlu1 %v991_v21, %s1890_s4 }
 0x264   :  { %1147 = vperm.xlu0 %1883, %v1857_v24   ;;  %1142 = vperm.xlu1 %1884, %v1856_v16  }
 0x268   :  { %1157 = vperm.xlu0 %1883, %v1859_v30   ;;  %1152 = vperm.xlu1 %1884, %v1858_v17  }
 0x26c   :  { %1162 = vperm.xlu1 %1884, %v1860_v1  }
 0x2ae   :  { %v2437_v23 = vpop.permute.xlu0 %1015  ;;  %v2439_v44 = vpop.permute.xlu1 %1013 }
 0x2b2   :  { %v2441_v57 = vpop.permute.xlu0 %1019  ;;  %v2443_v22 = vpop.permute.xlu1 %1017 }
 0x2b3   :  { %3332 = vst [vmem:[#allocation59_spill] sm:$0xff] %v2441_v57  ;;  %3333 = vst [vmem:[#allocation60_spill] sm:$0xff] %v2443_v22 }
 0x2b6   :  { %v2445_v25 = vpop.permute.xlu0 %1023  ;;  %v2447_v21 = vpop.permute.xlu1 %1021 }
 0x2b7   :  { %3334 = vst [vmem:[#allocation61_spill] sm:$0xff] %v2445_v25  ;;  %3335 = vst [vmem:[#allocation62_spill] sm:$0xff] %v2447_v21 }
 0x2ba   :  { %v2449_v24 = vpop.permute.xlu0 %1027  ;;  %v2451_v16 = vpop.permute.xlu1 %1025 }
 0x2bb   :  { %3336 = vst [vmem:[#allocation63_spill] sm:$0xff] %v2449_v24  ;;  %3337 = vst [vmem:[#allocation64_spill] sm:$0xff] %v2451_v16 }
 0x2be   :  { %v2453_v30 = vpop.permute.xlu0 %1031  ;;  %v2455_v17 = vpop.permute.xlu1 %1029 }
 0x2bf   :  { %3338 = vst [vmem:[#allocation65_spill] sm:$0xff] %v2453_v30  ;;  %3339 = vst [vmem:[#allocation66_spill] sm:$0xff] %v2455_v17 }
 0x2c2   :  { %v2457_v1 = vpop.permute.xlu0 %1035  ;;  %v2459_v54 = vpop.permute.xlu1 %1033 }
 0x2c3   :  { %3340 = vst [vmem:[#allocation67_spill] sm:$0xff] %v2457_v1  ;;  %3341 = vst [vmem:[#allocation68_spill] sm:$0xff] %v2459_v54 }
 0x2c6   :  { %v2461_v55 = vpop.permute.xlu0 %1039  ;;  %v2463_v26 = vpop.permute.xlu1 %1037 }
 0x2c7   :  { %3342 = vst [vmem:[#allocation69_spill] sm:$0xff] %v2461_v55  ;;  %3343 = vst [vmem:[#allocation70_spill] sm:$0xff] %v2463_v26  ;;  %v1861_v26 = vld.sshfl [vmem:[%s3228_s0] sm:$0x33 pattern:$0x75316420] }
 0x2c8   :  { %v1119_v13 = vcombine.high %v1861_v26, %v1861_v26 }
 0x2ca   :  { %v2465_v19 = vpop.permute.xlu0 %1043  ;;  %v2467_v25 = vpop.permute.xlu1 %1041 }
 0x2cb   :  { %3344 = vst [vmem:[#allocation71_spill] sm:$0xff] %v2465_v19  ;;  %3345 = vst [vmem:[#allocation72_spill] sm:$0xff] %v2467_v25  ;;  %v1123_v19 = vrot.slane %v1861_v26, %v2011_v37  ;;  %v1127_v25 = vrot.slane %v1861_v26, %v2008_v36 }
 0x2ce   :  { %v2469_v21 = vpop.permute.xlu0 %1047  ;;  %v2471_v24 = vpop.permute.xlu1 %1045 }
 0x2d2   :  { %v2473_v30 = vpop.permute.xlu0 %1051  ;;  %v1050_v17 = vpop.permute.xlu1 %1049 }
 0x2d3   :  { %v2477_v1 = vsel %vm1053_vm0, %v1050_v17, %v2473_v30 }
 0x2e3   :  { %v1143_v55 = vpop.permute.xlu1 %1142  ;;  %v1148_v18 = vpop.permute.xlu0 %1147 }
 0x2e4   :  { %v1165_v54 = vmul.f32 %v1143_v55, %v1123_v19  ;;  %v1166_v16 = vmul.f32 %v1143_v55, %v1127_v25  ;;  %v1167_v35 = vmul.f32 %v1148_v18, %v1123_v19  ;;  %v1168_v17 = vmul.f32 %v1148_v18, %v1127_v25 }
 0x2e6   :  { %1207 = vrot.lane.b32.xlu1 %v1166_v16, %s1891_s17  ;;  %1205 = vrot.lane.b32.xlu0 %v1165_v54, %s1891_s17  ;;  %v1131_v54 = vrot.slane %v1119_v13, %v2011_v37 }
 0x2e7   :  { %v1153_v22 = vpop.permute.xlu1 %1152  ;;  %v1158_v58 = vpop.permute.xlu0 %1157 }
 0x2e8   :  { %v1169_v57 = vmul.f32 %v1153_v22, %v1123_v19  ;;  %v1170_v0 = vmul.f32 %v1153_v22, %v1127_v25  ;;  %v1171_v12 = vmul.f32 %v1158_v58, %v1123_v19  ;;  %v1172_v52 = vmul.f32 %v1158_v58, %v1127_v25 }
 0x2e9   :  { %v1177_v26 = vmul.f32 %v1148_v18, %v1131_v54 }
 0x2ea   :  { %1211 = vrot.lane.b32.xlu1 %v1168_v17, %s1891_s17  ;;  %1209 = vrot.lane.b32.xlu0 %v1167_v35, %s1891_s17  ;;  %v1135_v17 = vrot.slane %v1119_v13, %v2008_v36 }
 0x2eb   :  { %v1163_v16 = vpop.permute.xlu1 %1162 }
 0x2ec   :  { %v1173_v35 = vmul.f32 %v1163_v16, %v1123_v19  ;;  %v1174_v53 = vmul.f32 %v1163_v16, %v1127_v25  ;;  %v1180_v13 = vmul.f32 %v1153_v22, %v1135_v17  ;;  %v1181_v19 = vmul.f32 %v1158_v58, %v1131_v54 }
 0x2ed   :  { %v1184_v25 = vmul.f32 %v1163_v16, %v1135_v17 }
 0x2ee   :  { %1215 = vrot.lane.b32.xlu1 %v1170_v0, %s1891_s17  ;;  %1213 = vrot.lane.b32.xlu0 %v1169_v57, %s1891_s17  ;;  %v1175_v0 = vmul.f32 %v1143_v55, %v1131_v54  ;;  %v1176_v57 = vmul.f32 %v1143_v55, %v1135_v17  ;;  %v1183_v55 = vmul.f32 %v1163_v16, %v1131_v54  ;;  %v1864_v16 = vld [vmem:[%s3227_s1 + $0x128] sm:$0xff] }
 0x2f2   :  { %1219 = vrot.lane.b32.xlu1 %v1172_v52, %s1891_s17  ;;  %1217 = vrot.lane.b32.xlu0 %v1171_v12, %s1891_s17  ;;  %v1178_v52 = vmul.f32 %v1148_v18, %v1135_v17  ;;  %v1179_v12 = vmul.f32 %v1153_v22, %v1131_v54  ;;  %v1863_v18 = vld [vmem:[%s3227_s1 + $0x120] sm:$0xff]  ;;  %v1862_v22 = vld [vmem:[%s3227_s1 + $0x118] sm:$0xff] }
 0x2f3   :  { %v1866_v54 = vld [vmem:[%s3227_s1 + $0x138] sm:$0xf] }
 0x2f6   :  { %1223 = vrot.lane.b32.xlu1 %v1174_v53, %s1891_s17  ;;  %1221 = vrot.lane.b32.xlu0 %v1173_v35, %s1891_s17  ;;  %v1182_v53 = vmul.f32 %v1158_v58, %v1135_v17  ;;  %v1865_v58 = vld [vmem:[%s3227_s1 + $0x130] sm:$0xff] }
 0x2fa   :  { %1227 = vrot.lane.b32.xlu1 %v1176_v57, %s1891_s17  ;;  %1225 = vrot.lane.b32.xlu0 %v1175_v0, %s1891_s17 }
 0x2fe   :  { %1231 = vrot.lane.b32.xlu1 %v1178_v52, %s1891_s17  ;;  %1229 = vrot.lane.b32.xlu0 %v1177_v26, %s1891_s17 }
 0x302   :  { %1235 = vrot.lane.b32.xlu1 %v1180_v13, %s1891_s17  ;;  %1233 = vrot.lane.b32.xlu0 %v1179_v12, %s1891_s17 }
 0x306   :  { %1239 = vrot.lane.b32.xlu1 %v1182_v53, %s1891_s17  ;;  %1237 = vrot.lane.b32.xlu0 %v1181_v19, %s1891_s17 }
 0x30a   :  { %1243 = vrot.lane.b32.xlu1 %v1184_v25, %s1891_s17  ;;  %1241 = vrot.lane.b32.xlu0 %v1183_v55, %s1891_s17 }
 0x30e   :  { %1349 = vperm.xlu1 %1884, %v1863_v18   ;;  %1344 = vperm.xlu0 %1883, %v1862_v22  }
 0x312   :  { %1359 = vperm.xlu1 %1884, %v1865_v58   ;;  %1354 = vperm.xlu0 %1883, %v1864_v16   ;;  %v121_v58 = vmul.f32 %v2047_v59, %v2013_v38 }
 0x316   :  { %1364 = vperm.xlu0 %1883, %v1866_v54   ;;  %v120_v54 = vmul.f32 %v2050_v60, %v2013_v38 }
 0x358   :  { %v1206_v17 = vpop.permute.xlu0 %1205  ;;  %v2521_v35 = vpop.permute.xlu1 %1207 }
 0x359   :  { %v2525_v0 = vsel %vm1245_vm1, %v1206_v17, %v2521_v35  ;;  %v123_v17 = vmul.f32 %v2047_v59, %v2015_v39 }
 0x35c   :  { %v1210_v57 = vpop.permute.xlu0 %1209  ;;  %v2527_v26 = vpop.permute.xlu1 %1211 }
 0x35d   :  { %v2531_v52 = vsel %vm1245_vm1, %v1210_v57, %v2527_v26 }
 0x360   :  { %v1214_v12 = vpop.permute.xlu0 %1213  ;;  %v2533_v13 = vpop.permute.xlu1 %1215 }
 0x361   :  { %3346 = vst [vmem:[#allocation73_spill] sm:$0xff] %v2533_v13  ;;  %v2537_v19 = vsel %vm1245_vm1, %v1214_v12, %v2533_v13 }
 0x362   :  { %3347 = vst [vmem:[#allocation74_spill] sm:$0xff] %v2537_v19  ;;  %v143_v19 = vadd.f32 %v123_v17, %v1997_v31 }
 0x364   :  { %v1218_v53 = vpop.permute.xlu0 %1217  ;;  %v2539_v55 = vpop.permute.xlu1 %1219 }
 0x365   :  { %3348 = vst [vmem:[#allocation75_spill] sm:$0xff] %v2539_v55  ;;  %v2543_v25 = vsel %vm1245_vm1, %v1218_v53, %v2539_v55  ;;  %v141_v53 = vadd.f32 %v121_v58, %v1993_v28  ;;  %v294_v55 = vsel %vm285_vm2, %v2201_v47, %v2199_v46  ;;  %v486_v58 = vsel %vm477_vm3, %v2239_v4, %v2241_v5 }
 0x366   :  { %3349 = vst [vmem:[#allocation76_spill] sm:$0xff] %v2543_v25 }
 0x367   :  { %v333_v25 = vadd.f32 %v2199_v46, %v141_v53  ;;  %v678_v46 = vsel %vm669_vm4, %v2279_v40, %v2281_v20  ;;  %v870_v40 = vsel %vm861_vm5, %v2374_v61, %v2376_v62 }
 0x368   :  { %v1222_v18 = vpop.permute.xlu0 %1221  ;;  %v2545_v22 = vpop.permute.xlu1 %1223 }
 0x369   :  { %3350 = vst [vmem:[#allocation77_spill] sm:$0xff] %v2545_v22  ;;  %v2551_v16 = vsel %vm1245_vm1, %v1222_v18, %v2545_v22  ;;  %v140_v22 = vadd.f32 %v120_v54, %v1993_v28  ;;  %v295_v54 = vsel %vm285_vm2, %v2205_v49, %v2203_v48  ;;  %v487_v49 = vsel %vm477_vm3, %v2243_v6, %v2245_v7 }
 0x36a   :  { %3351 = vst [vmem:[#allocation78_spill] sm:$0xff] %v2551_v16  ;;  %v122_v16 = vmul.f32 %v2050_v60, %v2015_v39  ;;  %v1062_v6 = vsel %vm1053_vm0, %v2471_v24, %v2469_v21 }
 0x36b   :  { %v332_v13 = vadd.f32 %v294_v55, %v140_v22  ;;  %v335_v55 = vadd.f32 %v2203_v48, %v143_v19 }
 0x36c   :  { %v1226_v57 = vpop.permute.xlu0 %1225  ;;  %v2557_v12 = vpop.permute.xlu1 %1227  ;;  %v142_v22 = vadd.f32 %v122_v16, %v1997_v31 }
 0x36d   :  { %v2565_v18 = vsel %vm1245_vm1, %v1226_v57, %v2557_v12  ;;  %v525_v57 = vadd.f32 %v2241_v5, %v333_v25  ;;  %v524_v17 = vadd.f32 %v486_v58, %v332_v13  ;;  %v527_v53 = vadd.f32 %v2245_v7, %v335_v55 }
 0x36e   :  { %v334_v25 = vadd.f32 %v295_v54, %v142_v22  ;;  %v679_v13 = vsel %vm669_vm4, %v2283_v2, %v2285_v3  ;;  %v871_v58 = vsel %vm861_vm5, %v2378_v56, %v2380_v45 }
 0x36f   :  { %v717_v5 = vadd.f32 %v2281_v20, %v525_v57  ;;  %v719_v16 = vadd.f32 %v2285_v3, %v527_v53 }
 0x370   :  { %v1230_v47 = vpop.permute.xlu0 %1229  ;;  %v2575_v38 = vpop.permute.xlu1 %1231  ;;  %v526_v61 = vadd.f32 %v487_v49, %v334_v25 }
 0x371   :  { %3352 = vst [vmem:[#allocation79_spill] sm:$0xff] %v2575_v38  ;;  %v2586_v4 = vsel %vm1245_vm1, %v1230_v47, %v2575_v38  ;;  %v716_v47 = vadd.f32 %v678_v46, %v524_v17  ;;  %v909_v19 = vadd.f32 %v2376_v62, %v717_v5  ;;  %v911_v24 = vadd.f32 %v2380_v45, %v719_v16  ;;  %v1867_v45 = vld.sshfl [vmem:[%s3228_s0] sm:$0x77 pattern:$0x75316420] }
 0x372   :  { %v718_v54 = vadd.f32 %v679_v13, %v526_v61  ;;  %v2633_v53 = vrot.slane %v1867_v45, %v2008_v36 }
 0x373   :  { %v908_v7 = vadd.f32 %v870_v40, %v716_v47  ;;  %v1101_v2 = vadd.f32 %v2469_v21, %v909_v19  ;;  %v1103_v3 = vadd.f32 %v2473_v30, %v911_v24  ;;  %v2636_v47 = vrot.slane %v1867_v45, %v2011_v37  ;;  %v1872_v24 = vld [vmem:[%s3227_s1 + $0x160] sm:$0xf] }
 0x374   :  { %v1234_v38 = vpop.permute.xlu0 %1233  ;;  %v2598_v48 = vpop.permute.xlu1 %1235  ;;  %v910_v22 = vadd.f32 %v871_v58, %v718_v54  ;;  %v1322_v30 = vsub.s32 2, %v2001_v33  ;;  %v1869_v54 = vld [vmem:[%s3227_s1 + $0x148] sm:$0xff] }
 0x375   :  { %3353 = vst [vmem:[#allocation80_spill] sm:$0xff] %v2598_v48  ;;  %v2609_v20 = vsel %vm1245_vm1, %v1234_v38, %v2598_v48  ;;  %v1100_v62 = vadd.f32 %v1062_v6, %v908_v7  ;;  %v3394_v48 = vld [vmem:[#allocation24_spill] sm:$0xff] }
 0x376   :  { %3354 = vst [vmem:[#allocation81_spill] sm:$0xff] %v2609_v20  ;;  %v1102_v49 = vadd.f32 %v2477_v1, %v910_v22  ;;  %v2641_v6 = vrot.slane %v1867_v45, %v1322_v30  ;;  %v3395_v20 = vld [vmem:[#allocation23_spill] sm:$0xff] }
 0x378   :  { %v1238_v57 = vpop.permute.xlu0 %1237  ;;  %v1240_v46 = vpop.permute.xlu1 %1239 }
 0x379   :  { %v1254_v55 = vsel %vm1245_vm1, %v1238_v57, %v1240_v46  ;;  %v2618_v38 = vadd.f32 %v1240_v46, %v1101_v2  ;;  %v1868_v2 = vld [vmem:[%s3227_s1 + $0x140] sm:$0xff]  ;;  %v1871_v57 = vld [vmem:[%s3227_s1 + $0x158] sm:$0xff] }
 0x37a   :  { %v2620_v17 = vadd.f32 %v1254_v55, %v1100_v62  ;;  %v1870_v62 = vld [vmem:[%s3227_s1 + $0x150] sm:$0xff]  ;;  %s1893_s1 = smov 94  }
 0x37b   :  { %3355 = vst [vmem:[#allocation82_spill] sm:$0xff] %v2618_v38  ;;  %v3384_v38 = vld [vmem:[#allocation48_spill] sm:$0xff] }
 0x37c   :  { %3356 = vst [vmem:[#allocation83_spill] sm:$0xff] %v2620_v17  ;;  %v1242_v56 = vpop.permute.xlu0 %1241  ;;  %v1244_v5 = vpop.permute.xlu1 %1243 }
 0x37d   :  { %v1255_v21 = vsel %vm1245_vm1, %v1242_v56, %v1244_v5  ;;  %v2625_v40 = vadd.f32 %v1244_v5, %v1103_v3 }
 0x37e   :  { %v2627_v25 = vadd.f32 %v1255_v21, %v1102_v49 }
 0x37f   :  { %3357 = vst [vmem:[#allocation84_spill] sm:$0xff] %v2625_v40 }
 0x380   :  { %3358 = vst [vmem:[#allocation85_spill] sm:$0xff] %v2627_v25  ;;  %v112_v25 = vmul.f32 %v2024_v42, %v2015_v39 }
 0x38d   :  { %v1345_v1 = vpop.permute.xlu0 %1344  ;;  %v1350_v61 = vpop.permute.xlu1 %1349 }
 0x38e   :  { %v1368_v13 = vmul.f32 %v1345_v1, %v2633_v53  ;;  %v1367_v19 = vmul.f32 %v1345_v1, %v2636_v47  ;;  %v1369_v7 = vmul.f32 %v1345_v1, %v2641_v6  ;;  %v1370_v16 = vmul.f32 %v1350_v61, %v2636_v47 }
 0x38f   :  { %v1371_v33 = vmul.f32 %v1350_v61, %v2633_v53  ;;  %v1372_v58 = vmul.f32 %v1350_v61, %v2641_v6 }
 0x390   :  { %1429 = vrot.lane.b32.xlu0 %v1368_v13, %s1892_s2  ;;  %1427 = vrot.lane.b32.xlu1 %v1367_v19, %s1892_s2 }
 0x391   :  { %v1355_v46 = vpop.permute.xlu0 %1354  ;;  %v1360_v49 = vpop.permute.xlu1 %1359 }
 0x392   :  { %v1373_v55 = vmul.f32 %v1355_v46, %v2636_v47  ;;  %v1374_v22 = vmul.f32 %v1355_v46, %v2633_v53  ;;  %v1375_v3 = vmul.f32 %v1355_v46, %v2641_v6  ;;  %v1377_v56 = vmul.f32 %v1360_v49, %v2633_v53 }
 0x393   :  { %v1376_v5 = vmul.f32 %v1360_v49, %v2636_v47  ;;  %v1378_v19 = vmul.f32 %v1360_v49, %v2641_v6 }
 0x394   :  { %1431 = vrot.lane.b32.xlu1 %v1369_v7, %s1892_s2  ;;  %1433 = vrot.lane.b32.xlu0 %v1370_v16, %s1892_s2  ;;  %v1311_v7 = vcombine.high %v1867_v45, %v1867_v45 }
 0x395   :  { %v1365_v21 = vpop.permute.xlu0 %1364 }
 0x396   :  { %v1379_v13 = vmul.f32 %v1365_v21, %v2636_v47  ;;  %v1381_v16 = vmul.f32 %v1365_v21, %v2641_v6 }
 0x398   :  { %1435 = vrot.lane.b32.xlu1 %v1371_v33, %s1892_s2  ;;  %1437 = vrot.lane.b32.xlu0 %v1372_v58, %s1892_s2  ;;  %v1380_v33 = vmul.f32 %v1365_v21, %v2633_v53  ;;  %v2685_v58 = vrot.slane %v1311_v7, %v2008_v36 }
 0x39a   :  { %v1383_v45 = vmul.f32 %v1345_v1, %v2685_v58 }
 0x39c   :  { %1596 = vperm.xlu1 %1884, %v1868_v2   ;;  %1601 = vperm.xlu0 %1883, %v1869_v54   ;;  %v2688_v2 = vrot.slane %v1311_v7, %v2011_v37 }
 0x39e   :  { %v1382_v54 = vmul.f32 %v1345_v1, %v2688_v2  ;;  %v1385_v36 = vmul.f32 %v1350_v61, %v2688_v2 }
 0x3a0   :  { %1606 = vperm.xlu1 %1884, %v1870_v62   ;;  %1611 = vperm.xlu0 %1883, %v1871_v57   ;;  %v2694_v62 = vrot.slane %v1311_v7, %v1322_v30  ;;  %v1389_v30 = vmul.f32 %v1355_v46, %v2685_v58 }
 0x3a2   :  { %v1384_v57 = vmul.f32 %v1345_v1, %v2694_v62  ;;  %v1387_v37 = vmul.f32 %v1350_v61, %v2694_v62  ;;  %v1391_v1 = vmul.f32 %v1360_v49, %v2688_v2 }
 0x3a4   :  { %1616 = vperm.xlu1 %1884, %v1872_v24   ;;  %1439 = vrot.lane.b32.xlu0 %v1373_v55, %s1892_s2  ;;  %v1386_v24 = vmul.f32 %v1350_v61, %v2685_v58  ;;  %v1388_v55 = vmul.f32 %v1355_v46, %v2688_v2  ;;  %v1393_v61 = vmul.f32 %v1360_v49, %v2694_v62 }
 0x3a8   :  { %1441 = vrot.lane.b32.xlu1 %v1374_v22, %s1892_s2  ;;  %1443 = vrot.lane.b32.xlu0 %v1375_v3, %s1892_s2  ;;  %v1390_v22 = vmul.f32 %v1355_v46, %v2694_v62  ;;  %v1392_v3 = vmul.f32 %v1360_v49, %v2685_v58  ;;  %v1396_v46 = vmul.f32 %v1365_v21, %v2694_v62 }
 0x3a9   :  { %v286_v49 = vsel %vm285_vm2, %v2150_v9, %v2148_v8  ;;  %v106_v9 = vmul.f32 %v2024_v42, %v2003_v34 }
 0x3ac   :  { %1447 = vrot.lane.b32.xlu0 %v1377_v56, %s1892_s2  ;;  %1445 = vrot.lane.b32.xlu1 %v1376_v5, %s1892_s2  ;;  %v1395_v56 = vmul.f32 %v1365_v21, %v2685_v58  ;;  %v1394_v5 = vmul.f32 %v1365_v21, %v2688_v2  ;;  %v107_v21 = vmul.f32 %v2021_v41, %v2003_v34 }
 0x3b0   :  { %1451 = vrot.lane.b32.xlu0 %v1379_v13, %s1892_s2  ;;  %1449 = vrot.lane.b32.xlu1 %v1378_v19, %s1892_s2  ;;  %v104_v13 = vmul.f32 %v2024_v42, %v1999_v32  ;;  %v105_v19 = vmul.f32 %v2021_v41, %v1999_v32 }
 0x3b2   :  { %v124_v7 = vadd.f32 %v104_v13, %v1991_v27  ;;  %v3362_v13 = vld [vmem:[#allocation32_spill] sm:$0xff] }
 0x3b4   :  { %1455 = vrot.lane.b32.xlu0 %v1381_v16, %s1892_s2  ;;  %1453 = vrot.lane.b32.xlu1 %v1380_v33, %s1892_s2  ;;  %v478_v16 = vsel %vm477_vm3, %v2207_v50, %v2209_v51  ;;  %v316_v33 = vadd.f32 %v286_v49, %v124_v7 }
 0x3b8   :  { %1459 = vrot.lane.b32.xlu0 %v1383_v45, %s1892_s2  ;;  %1457 = vrot.lane.b32.xlu1 %v1382_v54, %s1892_s2  ;;  %v670_v45 = vsel %vm669_vm4, %v2249_v11, %v2247_v10  ;;  %v125_v54 = vadd.f32 %v105_v19, %v1991_v27  ;;  %v1054_v11 = vsel %vm1053_vm0, %v2439_v44, %v2437_v23 }
 0x3ba   :  { %v317_v50 = vadd.f32 %v2148_v8, %v125_v54  ;;  %v3360_v8 = vld [vmem:[#allocation17_spill] sm:$0xff] }
 0x3bc   :  { %1463 = vrot.lane.b32.xlu0 %v1385_v36, %s1892_s2  ;;  %1461 = vrot.lane.b32.xlu1 %v1384_v57, %s1892_s2  ;;  %v508_v36 = vadd.f32 %v478_v16, %v316_v33  ;;  %v862_v57 = vsel %vm861_vm5, %v2342_v43, %v2344_v63  ;;  %v3363_v33 = vld [vmem:[#allocation46_spill] sm:$0xff] }
 0x3c0   :  { %1467 = vrot.lane.b32.xlu0 %v1387_v37, %s1892_s2  ;;  %1465 = vrot.lane.b32.xlu1 %v1386_v24, %s1892_s2  ;;  %v700_v37 = vadd.f32 %v670_v45, %v508_v36  ;;  %v127_v24 = vadd.f32 %v107_v21, %v1995_v29  ;;  %v3364_v21 = vld [vmem:[#allocation45_spill] sm:$0xff] }
 0x3c1   :  { %v863_v45 = vsel %vm861_vm5, %v3364_v21, %v3363_v33 }
 0x3c2   :  { %v319_v43 = vadd.f32 %v2162_v14, %v127_v24 }
 0x3c4   :  { %1471 = vrot.lane.b32.xlu0 %v1389_v30, %s1892_s2  ;;  %1469 = vrot.lane.b32.xlu1 %v1388_v55, %s1892_s2  ;;  %v287_v30 = vsel %vm285_vm2, %v2164_v15, %v2162_v14  ;;  %v126_v55 = vadd.f32 %v106_v9, %v1995_v29  ;;  %v3361_v15 = vld [vmem:[#allocation31_spill] sm:$0xff] }
 0x3c5   :  { %v671_v44 = vsel %vm669_vm4, %v3362_v13, %v3361_v15 }
 0x3c8   :  { %1475 = vrot.lane.b32.xlu0 %v1391_v1, %s1892_s2  ;;  %1473 = vrot.lane.b32.xlu1 %v1390_v22, %s1892_s2  ;;  %v509_v1 = vadd.f32 %v2209_v51, %v317_v50  ;;  %v892_v22 = vadd.f32 %v862_v57, %v700_v37  ;;  %v3365_v50 = vld [vmem:[#allocation59_spill] sm:$0xff]  ;;  %v3366_v37 = vld [vmem:[#allocation60_spill] sm:$0xff] }
 0x3cc   :  { %1479 = vrot.lane.b32.xlu0 %v1393_v61, %s1892_s2  ;;  %1477 = vrot.lane.b32.xlu1 %v1392_v3, %s1892_s2  ;;  %v3359_v61 = vld [vmem:[#allocation18_spill] sm:$0xff] }
 0x3cd   :  { %v479_v3 = vsel %vm477_vm3, %v3360_v8, %v3359_v61  ;;  %v511_v19 = vadd.f32 %v3359_v61, %v319_v43 }
 0x3cf   :  { %v703_v54 = vadd.f32 %v3361_v15, %v511_v19 }
 0x3d0   :  { %1483 = vrot.lane.b32.xlu0 %v1395_v56, %s1892_s2  ;;  %1481 = vrot.lane.b32.xlu1 %v1394_v5, %s1892_s2  ;;  %v318_v56 = vadd.f32 %v287_v30, %v126_v55  ;;  %v701_v5 = vadd.f32 %v2247_v10, %v509_v1 }
 0x3d1   :  { %v895_v24 = vadd.f32 %v3363_v33, %v703_v54 }
 0x3d2   :  { %v510_v49 = vadd.f32 %v479_v3, %v318_v56  ;;  %v893_v51 = vadd.f32 %v2344_v63, %v701_v5  ;;  %v1055_v63 = vsel %vm1053_vm0, %v3366_v37, %v3365_v50 }
 0x3d4   :  { %1485 = vrot.lane.b32.xlu1 %v1396_v46, %s1892_s2  ;;  %v1084_v46 = vadd.f32 %v1054_v11, %v892_v22  ;;  %v702_v9 = vadd.f32 %v671_v44, %v510_v49  ;;  %v1085_v36 = vadd.f32 %v2437_v23, %v893_v51  ;;  %v1087_v22 = vadd.f32 %v3365_v50, %v895_v24 }
 0x3d6   :  { %v1276_v14 = vadd.f32 %v2525_v0, %v1084_v46  ;;  %v894_v0 = vadd.f32 %v863_v45, %v702_v9  ;;  %v1277_v30 = vadd.f32 %v2521_v35, %v1085_v36  ;;  %v1279_v8 = vadd.f32 %v2527_v26, %v1087_v22 }
 0x3d8   :  { %v1086_v43 = vadd.f32 %v1055_v63, %v894_v0 }
 0x3da   :  { %v1278_v23 = vadd.f32 %v2531_v52, %v1086_v43 }
 0x402   :  { %v1430_v7 = vpop.permute.xlu0 %1429  ;;  %v1428_v16 = vpop.permute.xlu1 %1427 }
 0x403   :  { %v1488_v10 = vsel %vm1487_vm6, %v1428_v16, %v1430_v7 }
 0x404   :  { %v2773_v57 = vadd.f32 %v1488_v10, %v1276_v14 }
 0x406   :  { %v1434_v11 = vpop.permute.xlu0 %1433  ;;  %v1432_v55 = vpop.permute.xlu1 %1431 }
 0x407   :  { %v1489_v1 = vsel %vm1487_vm6, %v1430_v7, %v1432_v55 }
 0x408   :  { %v2782_v61 = vadd.f32 %v1489_v1, %v1277_v30 }
 0x40a   :  { %v1438_v3 = vpop.permute.xlu0 %1437  ;;  %v1436_v56 = vpop.permute.xlu1 %1435 }
 0x40b   :  { %v1490_v5 = vsel %vm1487_vm6, %v1434_v11, %v1436_v56  ;;  %v1491_v46 = vsel %vm1487_vm6, %v1436_v56, %v1438_v3 }
 0x40c   :  { %v2788_v35 = vadd.f32 %v1490_v5, %v1278_v23  ;;  %v2790_v15 = vadd.f32 %v1491_v46, %v1279_v8 }
 0x41b   :  { %v1597_v13 = vpop.permute.xlu1 %1596  ;;  %v1602_v19 = vpop.permute.xlu0 %1601 }
 0x41c   :  { %v1620_v44 = vmul.f32 %v1597_v13, %v2633_v53  ;;  %v1619_v49 = vmul.f32 %v1597_v13, %v2636_v47  ;;  %v1622_v26 = vmul.f32 %v1602_v19, %v2636_v47  ;;  %v1621_v52 = vmul.f32 %v1597_v13, %v2641_v6 }
 0x41d   :  { %v1624_v51 = vmul.f32 %v1602_v19, %v2641_v6  ;;  %v1623_v14 = vmul.f32 %v1602_v19, %v2633_v53  ;;  %v1634_v63 = vmul.f32 %v1597_v13, %v2688_v2  ;;  %v1636_v24 = vmul.f32 %v1597_v13, %v2694_v62 }
 0x41e   :  { %1681 = vrot.lane.b32.xlu1 %v1620_v44, %s1893_s1  ;;  %1679 = vrot.lane.b32.xlu0 %v1619_v49, %s1893_s1  ;;  %v1635_v30 = vmul.f32 %v1597_v13, %v2685_v58  ;;  %v1639_v11 = vmul.f32 %v1602_v19, %v2694_v62 }
 0x41f   :  { %v1607_v7 = vpop.permute.xlu1 %1606  ;;  %v1612_v21 = vpop.permute.xlu0 %1611 }
 0x420   :  { %v1626_v16 = vmul.f32 %v1607_v7, %v2633_v53  ;;  %v1625_v33 = vmul.f32 %v1607_v7, %v2636_v47  ;;  %v1628_v45 = vmul.f32 %v1612_v21, %v2636_v47  ;;  %v1627_v10 = vmul.f32 %v1607_v7, %v2641_v6 }
 0x421   :  { %v1630_v54 = vmul.f32 %v1612_v21, %v2641_v6  ;;  %v1629_v9 = vmul.f32 %v1612_v21, %v2633_v53  ;;  %v1642_v55 = vmul.f32 %v1607_v7, %v2694_v62  ;;  %v1641_v1 = vmul.f32 %v1607_v7, %v2685_v58 }
 0x422   :  { %1685 = vrot.lane.b32.xlu1 %v1622_v26, %s1893_s1  ;;  %1683 = vrot.lane.b32.xlu0 %v1621_v52, %s1893_s1  ;;  %v1644_v23 = vmul.f32 %v1612_v21, %v2685_v58  ;;  %v1643_v8 = vmul.f32 %v1612_v21, %v2688_v2  ;;  %v1645_v46 = vmul.f32 %v1612_v21, %v2694_v62 }
 0x423   :  { %v1617_v36 = vpop.permute.xlu1 %1616  ;;  %v2838_v22 = vpop.permute.xlu0 %1439 }
 0x424   :  { %v1632_v50 = vmul.f32 %v1617_v36, %v2633_v53  ;;  %v1631_v37 = vmul.f32 %v1617_v36, %v2636_v47  ;;  %v1633_v0 = vmul.f32 %v1617_v36, %v2641_v6  ;;  %v1638_v53 = vmul.f32 %v1602_v19, %v2685_v58 }
 0x425   :  { %v1637_v47 = vmul.f32 %v1602_v19, %v2688_v2  ;;  %v1640_v6 = vmul.f32 %v1607_v7, %v2688_v2  ;;  %v1646_v5 = vmul.f32 %v1617_v36, %v2688_v2  ;;  %v1648_v13 = vmul.f32 %v1617_v36, %v2694_v62 }
 0x426   :  { %1689 = vrot.lane.b32.xlu1 %v1624_v51, %s1893_s1  ;;  %1687 = vrot.lane.b32.xlu0 %v1623_v14, %s1893_s1  ;;  %v1647_v44 = vmul.f32 %v1617_v36, %v2685_v58 }
 0x427   :  { %v2840_v43 = vpop.permute.xlu1 %1441  ;;  %v2848_v3 = vpop.permute.xlu0 %1443 }
 0x42a   :  { %1693 = vrot.lane.b32.xlu1 %v1626_v16, %s1893_s1  ;;  %1691 = vrot.lane.b32.xlu0 %v1625_v33, %s1893_s1 }
 0x42b   :  { %v2850_v56 = vpop.permute.xlu1 %1445  ;;  %v2858_v49 = vpop.permute.xlu0 %1447 }
 0x42e   :  { %1697 = vrot.lane.b32.xlu1 %v1628_v45, %s1893_s1  ;;  %1695 = vrot.lane.b32.xlu0 %v1627_v10, %s1893_s1 }
 0x42f   :  { %v2860_v19 = vpop.permute.xlu1 %1449  ;;  %v2864_v26 = vpop.permute.xlu0 %1451 }
 0x432   :  { %1701 = vrot.lane.b32.xlu1 %v1630_v54, %s1893_s1  ;;  %1699 = vrot.lane.b32.xlu0 %v1629_v9, %s1893_s1 }
 0x433   :  { %v2866_v2 = vpop.permute.xlu1 %1453  ;;  %v2868_v52 = vpop.permute.xlu0 %1455 }
 0x436   :  { %1705 = vrot.lane.b32.xlu1 %v1632_v50, %s1893_s1  ;;  %1703 = vrot.lane.b32.xlu0 %v1631_v37, %s1893_s1  ;;  %v115_v50 = vmul.f32 %v2047_v59, %v1999_v32  ;;  %v3371_v37 = vld [vmem:[#allocation3_spill] sm:$0xff] }
 0x437   :  { %v2870_v51 = vpop.permute.xlu1 %1457  ;;  %v2872_v14 = vpop.permute.xlu0 %1459 }
 0x43a   :  { %1709 = vrot.lane.b32.xlu1 %v1634_v63, %s1893_s1  ;;  %1707 = vrot.lane.b32.xlu0 %v1633_v0, %s1893_s1  ;;  %v108_v63 = vmul.f32 %v2024_v42, %v3371_v37  ;;  %v114_v0 = vmul.f32 %v2050_v60, %v1999_v32 }
 0x43b   :  { %v2874_v62 = vpop.permute.xlu1 %1461  ;;  %v2876_v58 = vpop.permute.xlu0 %1463 }
 0x43e   :  { %1713 = vrot.lane.b32.xlu1 %v1636_v24, %s1893_s1  ;;  %1711 = vrot.lane.b32.xlu0 %v1635_v30, %s1893_s1  ;;  %v109_v24 = vmul.f32 %v2021_v41, %v3371_v37  ;;  %v117_v30 = vmul.f32 %v2047_v59, %v2003_v34 }
 0x43f   :  { %v2878_v7 = vpop.permute.xlu1 %1465  ;;  %v2880_v16 = vpop.permute.xlu0 %1467 }
 0x442   :  { %1717 = vrot.lane.b32.xlu1 %v1638_v53, %s1893_s1  ;;  %1715 = vrot.lane.b32.xlu0 %v1637_v47, %s1893_s1  ;;  %v116_v53 = vmul.f32 %v2050_v60, %v2003_v34  ;;  %v119_v47 = vmul.f32 %v2047_v59, %v3371_v37  ;;  %v3377_v34 = vld [vmem:[#allocation2_spill] sm:$0xff] }
 0x443   :  { %v2882_v33 = vpop.permute.xlu1 %1469  ;;  %v2884_v21 = vpop.permute.xlu0 %1471  ;;  %v129_v40 = vadd.f32 %v109_v24, %v3377_v34 }
 0x446   :  { %1721 = vrot.lane.b32.xlu1 %v1640_v6, %s1893_s1  ;;  %1719 = vrot.lane.b32.xlu0 %v1639_v11, %s1893_s1 }
 0x447   :  { %v2886_v45 = vpop.permute.xlu1 %1473  ;;  %v2888_v10 = vpop.permute.xlu0 %1475 }
 0x448   :  { %3367 = vst [vmem:[#allocation18_spill] sm:$0xff] %v2888_v10 }
 0x44a   :  { %1725 = vrot.lane.b32.xlu1 %v1642_v55, %s1893_s1  ;;  %1723 = vrot.lane.b32.xlu0 %v1641_v1, %s1893_s1  ;;  %v3374_v55 = vld [vmem:[#allocation5_spill] sm:$0xff]  ;;  %v3375_v1 = vld [vmem:[#allocation6_spill] sm:$0xff] }
 0x44b   :  { %v2890_v54 = vpop.permute.xlu1 %1477  ;;  %v2892_v9 = vpop.permute.xlu0 %1479  ;;  %v288_v32 = vsel %vm285_vm2, %v3375_v1, %v3374_v55  ;;  %v113_v1 = vmul.f32 %v2021_v41, %v2015_v39  ;;  %v3380_v39 = vld [vmem:[#allocation34_spill] sm:$0xff] }
 0x44c   :  { %3368 = vst [vmem:[#allocation17_spill] sm:$0xff] %v2890_v54  ;;  %3369 = vst [vmem:[#allocation31_spill] sm:$0xff] %v2892_v9  ;;  %v3385_v9 = vld [vmem:[#allocation47_spill] sm:$0xff] }
 0x44e   :  { %1729 = vrot.lane.b32.xlu1 %v1644_v23, %s1893_s1  ;;  %1727 = vrot.lane.b32.xlu0 %v1643_v8, %s1893_s1  ;;  %v3376_v23 = vld [vmem:[#allocation4_spill] sm:$0xff] }
 0x44f   :  { %v2894_v36 = vpop.permute.xlu1 %1481  ;;  %v2910_v6 = vpop.permute.xlu0 %1483  ;;  %v111_v8 = vmul.f32 %v2021_v41, %v3376_v23  ;;  %v110_v59 = vmul.f32 %v2024_v42, %v3376_v23  ;;  %v2936_v23 = vadd.f32 %v116_v53, %v1995_v29  ;;  %v3381_v42 = vld [vmem:[#allocation33_spill] sm:$0xff]  ;;  %v3383_v53 = vld [vmem:[#allocation8_spill] sm:$0xff] }
 0x450   :  { %3370 = vst [vmem:[#allocation32_spill] sm:$0xff] %v2894_v36  ;;  %3372 = vst [vmem:[#allocation46_spill] sm:$0xff] %v2910_v6 }
 0x451   :  { %v131_v41 = vadd.f32 %v111_v8, %v1993_v28  ;;  %v321_v8 = vadd.f32 %v3374_v55, %v129_v40  ;;  %v3390_v55 = vld [vmem:[#allocation22_spill] sm:$0xff] }
 0x452   :  { %1733 = vrot.lane.b32.xlu1 %v1646_v5, %s1893_s1  ;;  %1731 = vrot.lane.b32.xlu0 %v1645_v46, %s1893_s1  ;;  %v135_v5 = vadd.f32 %v115_v50, %v1991_v27  ;;  %v118_v46 = vmul.f32 %v2050_v60, %v3371_v37  ;;  %v3378_v50 = vld [vmem:[#allocation20_spill] sm:$0xff] }
 0x453   :  { %v2912_v11 = vpop.permute.xlu1 %1485 }
 0x454   :  { %3373 = vst [vmem:[#allocation45_spill] sm:$0xff] %v2912_v11  ;;  %v3379_v11 = vld [vmem:[#allocation19_spill] sm:$0xff]  ;;  %v2943_v36 = vadd.f32 %v118_v46, %v3377_v34  ;;  %v133_v46 = vadd.f32 %v113_v1, %v1997_v31 }
 0x455   :  { %v480_v60 = vsel %vm477_vm3, %v3379_v11, %v3378_v50  ;;  %v672_v11 = vsel %vm669_vm4, %v3381_v42, %v3380_v39  ;;  %v864_v42 = vsel %vm861_vm5, %v3385_v9, %v3384_v38  ;;  %v3391_v9 = vld [vmem:[#allocation21_spill] sm:$0xff] }
 0x456   :  { %1737 = vrot.lane.b32.xlu1 %v1648_v13, %s1893_s1  ;;  %1735 = vrot.lane.b32.xlu0 %v1647_v44, %s1893_s1  ;;  %v128_v13 = vadd.f32 %v108_v63, %v3377_v34  ;;  %v134_v44 = vadd.f32 %v114_v0, %v1991_v27  ;;  %v137_v63 = vadd.f32 %v117_v30, %v1995_v29  ;;  %v3382_v29 = vld [vmem:[#allocation7_spill] sm:$0xff] }
 0x457   :  { %v2939_v27 = vadd.f32 %v119_v47, %v3377_v34  ;;  %v130_v30 = vadd.f32 %v110_v59, %v1993_v28  ;;  %v289_v47 = vsel %vm285_vm2, %v3383_v53, %v3382_v29  ;;  %v132_v34 = vadd.f32 %v112_v25, %v1997_v31  ;;  %v3386_v28 = vld [vmem:[#allocation9_spill] sm:$0xff]  ;;  %v3387_v59 = vld [vmem:[#allocation10_spill] sm:$0xff]  ;;  %v3388_v53 = vld [vmem:[#allocation11_spill] sm:$0xff] }
 0x458   :  { %v320_v37 = vadd.f32 %v288_v32, %v128_v13  ;;  %v290_v17 = vsel %vm285_vm2, %v3387_v59, %v3386_v28  ;;  %v481_v1 = vsel %vm477_vm3, %v3391_v9, %v3390_v55 }
 0x459   :  { %v322_v25 = vadd.f32 %v289_v47, %v130_v30  ;;  %v324_v10 = vadd.f32 %v290_v17, %v132_v34  ;;  %v327_v30 = vadd.f32 %v3388_v53, %v135_v5  ;;  %v3397_v5 = vld [vmem:[#allocation35_spill] sm:$0xff]  ;;  %v3398_v34 = vld [vmem:[#allocation74_spill] sm:$0xff] }
 0x45a   :  { %v512_v13 = vadd.f32 %v480_v60, %v320_v37  ;;  %v3389_v60 = vld [vmem:[#allocation12_spill] sm:$0xff] }
 0x45b   :  { %v514_v9 = vadd.f32 %v481_v1, %v322_v25 }
 0x45c   :  { %v704_v37 = vadd.f32 %v672_v11, %v512_v13  ;;  %v513_v11 = vadd.f32 %v3378_v50, %v321_v8  ;;  %v3396_v50 = vld [vmem:[#allocation36_spill] sm:$0xff]  ;;  %v1492_v8 = vsel %vm1487_vm6, %v2838_v22, %v2840_v43 }
 0x45e   :  { %v896_v13 = vadd.f32 %v864_v42, %v704_v37  ;;  %v3400_v37 = vld [vmem:[#allocation14_spill] sm:$0xff] }
 0x490   :  { %v1680_v0 = vpop.permute.xlu0 %1679  ;;  %v1682_v24 = vpop.permute.xlu1 %1681 }
 0x491   :  { %v1740_v32 = vsel %vm1739_vm7, %v1680_v0, %v1682_v24  ;;  %v323_v0 = vadd.f32 %v3382_v29, %v131_v41  ;;  %v3392_v41 = vld [vmem:[#allocation61_spill] sm:$0xff] }
 0x492   :  { %v1780_v6 = vadd.f32 %v1740_v32, %v2773_v57  ;;  %v291_v57 = vsel %vm285_vm2, %v3389_v60, %v3388_v53  ;;  %v3393_v32 = vld [vmem:[#allocation62_spill] sm:$0xff]  ;;  %v325_v60 = vadd.f32 %v3386_v28, %v133_v46  ;;  %v3399_v53 = vld [vmem:[#allocation13_spill] sm:$0xff] }
 0x493   :  { %v1056_v29 = vsel %vm1053_vm0, %v3393_v32, %v3392_v41  ;;  %v326_v47 = vadd.f32 %v291_v57, %v134_v44  ;;  %v515_v54 = vadd.f32 %v3390_v55, %v323_v0  ;;  %v482_v32 = vsel %vm477_vm3, %v3395_v20, %v3394_v48  ;;  %v3401_v55 = vld [vmem:[#allocation50_spill] sm:$0xff] }
 0x494   :  { %1800 = vst [vmem:[%s3229_s3] sm:$0xff] %v1780_v6  ;;  %v1684_v31 = vpop.permute.xlu0 %1683  ;;  %v1686_v40 = vpop.permute.xlu1 %1685  ;;  %v673_v44 = vsel %vm669_vm4, %v3397_v5, %v3396_v50  ;;  %v3003_v57 = vadd.f32 %v3399_v53, %v137_v63  ;;  %v292_v25 = vsel %vm285_vm2, %v3400_v37, %v3399_v53  ;;  %v516_v22 = vadd.f32 %v482_v32, %v324_v10  ;;  %v3403_v63 = vld [vmem:[#allocation38_spill] sm:$0xff] }
 0x495   :  { %v1741_v59 = vsel %vm1739_vm7, %v1682_v24, %v1684_v31  ;;  %v705_v24 = vadd.f32 %v3380_v39, %v513_v11  ;;  %v1088_v31 = vadd.f32 %v1056_v29, %v896_v13  ;;  %v706_v29 = vadd.f32 %v673_v44, %v514_v9  ;;  %v3404_v11 = vld [vmem:[#allocation37_spill] sm:$0xff] }
 0x496   :  { %v1781_v6 = vadd.f32 %v1741_v59, %v2782_v61  ;;  %v674_v13 = vsel %vm669_vm4, %v3404_v11, %v3403_v63  ;;  %v1493_v9 = vsel %vm1487_vm6, %v2840_v43, %v2848_v3  ;;  %v328_v5 = vadd.f32 %v292_v25, %v2936_v23  ;;  %v3417_v11 = vld [vmem:[#allocation16_spill] sm:$0xff] }
 0x497   :  { %v897_v46 = vadd.f32 %v3384_v38, %v705_v24  ;;  %v1280_v42 = vadd.f32 %v3398_v34, %v1088_v31  ;;  %v707_v38 = vadd.f32 %v3396_v50, %v515_v54  ;;  %v3405_v54 = vld [vmem:[#allocation63_spill] sm:$0xff]  ;;  %v517_v44 = vadd.f32 %v3394_v48, %v325_v60  ;;  %v3412_v48 = vld [vmem:[#allocation65_spill] sm:$0xff]  ;;  %v3413_v60 = vld [vmem:[#allocation66_spill] sm:$0xff] }
 0x498   :  { %1801 = vst.msk [vmem:[%s3229_s3 + $0x8] sm:$0xff] %vm1245_vm1, %v1781_v6  ;;  %v1688_v61 = vpop.permute.xlu0 %1687  ;;  %v1690_v17 = vpop.permute.xlu1 %1689  ;;  %v3406_v6 = vld [vmem:[#allocation64_spill] sm:$0xff]  ;;  %v3411_v34 = vld [vmem:[#allocation51_spill] sm:$0xff]  ;;  %v708_v3 = vadd.f32 %v674_v13, %v516_v22  ;;  %v1058_v37 = vsel %vm1053_vm0, %v3413_v60, %v3412_v48  ;;  %v1494_v25 = vsel %vm1487_vm6, %v2850_v56, %v2858_v49  ;;  %v1495_v22 = vsel %vm1487_vm6, %v2858_v49, %v2860_v19  ;;  %v3426_v60 = vld [vmem:[#allocation41_spill] sm:$0xff] }
 0x499   :  { %v1742_v20 = vsel %vm1739_vm7, %v1686_v40, %v1688_v61  ;;  %v1743_v39 = vsel %vm1739_vm7, %v1688_v61, %v1690_v17  ;;  %v3402_v40 = vld [vmem:[#allocation49_spill] sm:$0xff]  ;;  %v1089_v59 = vadd.f32 %v3392_v41, %v897_v46  ;;  %v1057_v41 = vsel %vm1053_vm0, %v3406_v6, %v3405_v54  ;;  %v3410_v46 = vld [vmem:[#allocation52_spill] sm:$0xff] }
 0x49a   :  { %v1782_v0 = vadd.f32 %v1742_v20, %v2788_v35  ;;  %v1783_v28 = vadd.f32 %v1743_v39, %v2790_v15  ;;  %v865_v1 = vsel %vm861_vm5, %v3402_v40, %v3401_v55  ;;  %v1532_v35 = vadd.f32 %v1492_v8, %v1280_v42  ;;  %v3407_v61 = vld [vmem:[#allocation73_spill] sm:$0xff]  ;;  %v3408_v8 = vld [vmem:[#allocation26_spill] sm:$0xff]  ;;  %v3418_v56 = vld [vmem:[#allocation28_spill] sm:$0xff] }
 0x49b   :  { %v898_v24 = vadd.f32 %v865_v1, %v706_v29  ;;  %v899_v31 = vadd.f32 %v3401_v55, %v707_v38  ;;  %v1281_v17 = vadd.f32 %v3407_v61, %v1089_v59  ;;  %v3409_v20 = vld [vmem:[#allocation25_spill] sm:$0xff]  ;;  %v866_v43 = vsel %vm861_vm5, %v3411_v34, %v3410_v46  ;;  %v3414_v1 = vld [vmem:[#allocation76_spill] sm:$0xff]  ;;  %v3415_v29 = vld [vmem:[#allocation75_spill] sm:$0xff] }
 0x49c   :  { %1802 = vst [vmem:[%s3229_s3 + $0x10] sm:$0xff] %v1782_v0  ;;  %1803 = vst.msk [vmem:[%s3229_s3 + $0x18] sm:$0xff] %vm1245_vm1, %v1783_v28  ;;  %v1692_v15 = vpop.permute.xlu0 %1691  ;;  %v1694_v10 = vpop.permute.xlu1 %1693  ;;  %v483_v39 = vsel %vm477_vm3, %v3409_v20, %v3408_v8  ;;  %v900_v40 = vadd.f32 %v866_v43, %v708_v3  ;;  %v519_v6 = vadd.f32 %v3408_v8, %v327_v30  ;;  %v3420_v61 = vld [vmem:[#allocation40_spill] sm:$0xff]  ;;  %v3422_v8 = vld [vmem:[#allocation78_spill] sm:$0xff] }
 0x49d   :  { %v1744_v32 = vsel %vm1739_vm7, %v1692_v15, %v1694_v10  ;;  %v1091_v42 = vadd.f32 %v3405_v54, %v899_v31  ;;  %v1090_v0 = vadd.f32 %v1057_v41, %v898_v24  ;;  %v1533_v28 = vadd.f32 %v1493_v9, %v1281_v17  ;;  %v3416_v15 = vld [vmem:[#allocation15_spill] sm:$0xff] }
 0x49e   :  { %v1784_v50 = vadd.f32 %v1744_v32, %v1532_v35  ;;  %v293_v13 = vsel %vm285_vm2, %v3417_v11, %v3416_v15  ;;  %v518_v54 = vadd.f32 %v483_v39, %v326_v47  ;;  %v3419_v41 = vld [vmem:[#allocation27_spill] sm:$0xff]  ;;  %v709_v49 = vadd.f32 %v3403_v63, %v517_v44 }
 0x49f   :  { %v1282_v38 = vadd.f32 %v3414_v1, %v1090_v0  ;;  %v1283_v59 = vadd.f32 %v3415_v29, %v1091_v42  ;;  %v484_v9 = vsel %vm477_vm3, %v3419_v41, %v3418_v56  ;;  %v1092_v19 = vadd.f32 %v1058_v37, %v900_v40  ;;  %v3421_v47 = vld [vmem:[#allocation39_spill] sm:$0xff]  ;;  %v3423_v0 = vld [vmem:[#allocation54_spill] sm:$0xff]  ;;  %v3428_v40 = vld [vmem:[#allocation68_spill] sm:$0xff] }
 0x4a0   :  { %1804 = vst [vmem:[%s3229_s3 + $0x20] sm:$0xff] %v1784_v50  ;;  %v1696_v23 = vpop.permute.xlu0 %1695  ;;  %v1698_v53 = vpop.permute.xlu1 %1697  ;;  %v675_v30 = vsel %vm669_vm4, %v3421_v47, %v3420_v61  ;;  %v1496_v17 = vsel %vm1487_vm6, %v2864_v26, %v2866_v2  ;;  %v901_v44 = vadd.f32 %v3410_v46, %v709_v49  ;;  %v331_v43 = vadd.f32 %v3416_v15, %v2939_v27  ;;  %v3433_v49 = vld [vmem:[#allocation55_spill] sm:$0xff] }
 0x4a1   :  { %v1745_v55 = vsel %vm1739_vm7, %v1694_v10, %v1696_v23  ;;  %v1534_v10 = vadd.f32 %v1494_v25, %v1282_v38  ;;  %v1535_v32 = vadd.f32 %v1495_v22, %v1283_v59  ;;  %v1284_v20 = vadd.f32 %v3422_v8, %v1092_v19 }
 0x4a2   :  { %v1785_v35 = vadd.f32 %v1745_v55, %v1533_v28  ;;  %v330_v3 = vadd.f32 %v293_v13, %v2943_v36  ;;  %v711_v42 = vadd.f32 %v3420_v61, %v519_v6  ;;  %v3424_v28 = vld [vmem:[#allocation53_spill] sm:$0xff]  ;;  %v710_v23 = vadd.f32 %v675_v30, %v518_v54  ;;  %v3427_v55 = vld [vmem:[#allocation67_spill] sm:$0xff] }
 0x4a3   :  { %v867_v26 = vsel %vm861_vm5, %v3424_v28, %v3423_v0  ;;  %v1093_v37 = vadd.f32 %v3412_v48, %v901_v44  ;;  %v1536_v25 = vadd.f32 %v1496_v17, %v1284_v20  ;;  %v520_v22 = vadd.f32 %v484_v9, %v328_v5  ;;  %v3430_v5 = vld [vmem:[#allocation30_spill] sm:$0xff]  ;;  %v3431_v54 = vld [vmem:[#allocation29_spill] sm:$0xff]  ;;  %v3432_v9 = vld [vmem:[#allocation56_spill] sm:$0xff] }
 0x4a4   :  { %1805 = vst.msk [vmem:[%s3229_s3 + $0x28] sm:$0xff] %vm1245_vm1, %v1785_v35  ;;  %v1700_v24 = vpop.permute.xlu0 %1699  ;;  %v1702_v31 = vpop.permute.xlu1 %1701  ;;  %v1059_v1 = vsel %vm1053_vm0, %v3428_v40, %v3427_v55  ;;  %v1497_v48 = vsel %vm1487_vm6, %v2866_v2, %v2868_v52  ;;  %v902_v29 = vadd.f32 %v867_v26, %v710_v23  ;;  %v903_v59 = vadd.f32 %v3423_v0, %v711_v42  ;;  %v3429_v35 = vld [vmem:[#allocation77_spill] sm:$0xff]  ;;  %v3436_v0 = vld [vmem:[#allocation44_spill] sm:$0xff]  ;;  %v3440_v40 = vld [vmem:[#allocation71_spill] sm:$0xff] }
 0x4a5   :  { %v1746_v63 = vsel %vm1739_vm7, %v1698_v53, %v1700_v24  ;;  %v1747_v50 = vsel %vm1739_vm7, %v1700_v24, %v1702_v31  ;;  %v3425_v53 = vld [vmem:[#allocation42_spill] sm:$0xff]  ;;  %v1285_v15 = vadd.f32 %v3429_v35, %v1093_v37  ;;  %v521_v13 = vadd.f32 %v3418_v56, %v3003_v57  ;;  %v3439_v37 = vld [vmem:[#allocation57_spill] sm:$0xff] }
 0x4a6   :  { %v1786_v39 = vadd.f32 %v1746_v63, %v1534_v10  ;;  %v1787_v34 = vadd.f32 %v1747_v50, %v1535_v32  ;;  %v676_v46 = vsel %vm669_vm4, %v3426_v60, %v3425_v53  ;;  %v485_v6 = vsel %vm477_vm3, %v3431_v54, %v3430_v5  ;;  %v3434_v10 = vld [vmem:[#allocation69_spill] sm:$0xff]  ;;  %v3435_v32 = vld [vmem:[#allocation70_spill] sm:$0xff] }
 0x4a7   :  { %v712_v41 = vadd.f32 %v676_v46, %v520_v22  ;;  %v868_v2 = vsel %vm861_vm5, %v3433_v49, %v3432_v9  ;;  %v1095_v52 = vadd.f32 %v3427_v55, %v903_v59  ;;  %v1094_v19 = vadd.f32 %v1059_v1, %v902_v29  ;;  %v3438_v46 = vld [vmem:[#allocation58_spill] sm:$0xff]  ;;  %v3441_v1 = vld [vmem:[#allocation72_spill] sm:$0xff] }
 0x4a8   :  { %1806 = vst [vmem:[%s3229_s3 + $0x30] sm:$0xff] %v1786_v39  ;;  %1807 = vst.msk [vmem:[%s3229_s3 + $0x38] sm:$0xff] %vm1245_vm1, %v1787_v34  ;;  %v1704_v36 = vpop.permute.xlu0 %1703  ;;  %v1706_v27 = vpop.permute.xlu1 %1705  ;;  %v1060_v24 = vsel %vm1053_vm0, %v3435_v32, %v3434_v10  ;;  %v1537_v31 = vadd.f32 %v1497_v48, %v1285_v15  ;;  %v1498_v61 = vsel %vm1487_vm6, %v2870_v51, %v2872_v14  ;;  %v3442_v15 = vld [vmem:[#allocation79_spill] sm:$0xff] }
 0x4a9   :  { %v1748_v38 = vsel %vm1739_vm7, %v1704_v36, %v1706_v27  ;;  %v1499_v47 = vsel %vm1487_vm6, %v2872_v14, %v2874_v62  ;;  %v904_v17 = vadd.f32 %v868_v2, %v712_v41  ;;  %v1286_v63 = vadd.f32 %v2565_v18, %v1094_v19  ;;  %v3437_v18 = vld [vmem:[#allocation43_spill] sm:$0xff]  ;;  %v3443_v2 = vld [vmem:[#allocation81_spill] sm:$0xff]  ;;  %v3444_v19 = vld [vmem:[#allocation80_spill] sm:$0xff] }
 0x4aa   :  { %v1788_v11 = vadd.f32 %v1748_v38, %v1536_v25  ;;  %v1287_v50 = vadd.f32 %v2557_v12, %v1095_v52  ;;  %v522_v8 = vadd.f32 %v485_v6, %v330_v3  ;;  %v523_v20 = vadd.f32 %v3430_v5, %v331_v43 }
 0x4ab   :  { %v713_v39 = vadd.f32 %v3425_v53, %v521_v13  ;;  %v1096_v34 = vadd.f32 %v1060_v24, %v904_v17  ;;  %v1538_v51 = vadd.f32 %v1498_v61, %v1286_v63  ;;  %v677_v12 = vsel %vm669_vm4, %v3437_v18, %v3436_v0  ;;  %v3446_v61 = vld [vmem:[#allocation18_spill] sm:$0xff]  ;;  %v3447_v63 = vld [vmem:[#allocation83_spill] sm:$0xff] }
 0x4ac   :  { %1808 = vst [vmem:[%s3229_s3 + $0x40] sm:$0xf] %v1788_v11  ;;  %v1708_v57 = vpop.permute.xlu0 %1707  ;;  %v1710_v56 = vpop.permute.xlu1 %1709  ;;  %v1539_v42 = vadd.f32 %v1499_v47, %v1287_v50  ;;  %v1500_v43 = vsel %vm1487_vm6, %v2876_v58, %v2878_v7  ;;  %v869_v25 = vsel %vm861_vm5, %v3439_v37, %v3438_v46  ;;  %v715_v36 = vadd.f32 %v3436_v0, %v523_v20  ;;  %v3448_v20 = vld [vmem:[#allocation31_spill] sm:$0xff]  ;;  %v3450_v18 = vld [vmem:[#allocation46_spill] sm:$0xff] }
 0x4ad   :  { %v1749_v30 = vsel %vm1739_vm7, %v1706_v27, %v1708_v57  ;;  %v905_v26 = vadd.f32 %v3432_v9, %v713_v39  ;;  %v1288_v23 = vadd.f32 %v2586_v4, %v1096_v34  ;;  %v714_v27 = vadd.f32 %v677_v12, %v522_v8  ;;  %v3451_v12 = vld [vmem:[#allocation32_spill] sm:$0xff] }
 0x4ae   :  { %v1789_v44 = vadd.f32 %v1749_v30, %v1537_v31  ;;  %v1061_v48 = vsel %vm1053_vm0, %v3441_v1, %v3440_v40  ;;  %v1501_v38 = vsel %vm1487_vm6, %v2878_v7, %v2880_v16  ;;  %v907_v35 = vadd.f32 %v3438_v46, %v715_v36  ;;  %v3454_v46 = vld [vmem:[#allocation84_spill] sm:$0xff] }
 0x4af   :  { %v1097_v22 = vadd.f32 %v3434_v10, %v905_v26  ;;  %v1540_v58 = vadd.f32 %v1500_v43, %v1288_v23  ;;  %v906_v59 = vadd.f32 %v869_v25, %v714_v27  ;;  %v1502_v7 = vsel %vm1487_vm6, %v2882_v33, %v2884_v21 }
 0x4b0   :  { %1810 = vst.msk [vmem:[%s3229_s3 + $0x48] sm:$0xf] %vm1809_vm8, %v1789_v44  ;;  %v1712_v14 = vpop.permute.xlu0 %1711  ;;  %v1714_v62 = vpop.permute.xlu1 %1713  ;;  %v1099_v5 = vadd.f32 %v3440_v40, %v907_v35  ;;  %v1503_v16 = vsel %vm1487_vm6, %v2884_v21, %v2886_v45  ;;  %v1506_v43 = vsel %vm1487_vm6, %v3451_v12, %v3450_v18 }
 0x4b1   :  { %v1750_v3 = vsel %vm1739_vm7, %v1710_v56, %v1712_v14  ;;  %v1751_v28 = vsel %vm1739_vm7, %v1712_v14, %v1714_v62  ;;  %v1289_v11 = vadd.f32 %v3442_v15, %v1097_v22  ;;  %v1098_v54 = vadd.f32 %v1061_v48, %v906_v59  ;;  %v3445_v56 = vld [vmem:[#allocation17_spill] sm:$0xff] }
 0x4b2   :  { %v1790_v53 = vadd.f32 %v1750_v3, %v1538_v51  ;;  %v1791_v60 = vadd.f32 %v1751_v28, %v1539_v42  ;;  %v1291_v10 = vadd.f32 %v3444_v19, %v1099_v5  ;;  %v1504_v21 = vsel %vm1487_vm6, %v3446_v61, %v3445_v56  ;;  %v3449_v42 = vld [vmem:[#allocation82_spill] sm:$0xff]  ;;  %v3452_v3 = vld [vmem:[#allocation45_spill] sm:$0xff] }
 0x4b3   :  { %v1541_v6 = vadd.f32 %v1501_v38, %v1289_v11  ;;  %v1290_v52 = vadd.f32 %v3443_v2, %v1098_v54  ;;  %v1544_v50 = vadd.f32 %v1504_v21, %v3447_v63  ;;  %v1505_v39 = vsel %vm1487_vm6, %v3445_v56, %v3448_v20 }
 0x4b4   :  { %1811 = vst [vmem:[%s3229_s3 + $0x50] sm:$0xff] %v1790_v53  ;;  %1812 = vst.msk [vmem:[%s3229_s3 + $0x58] sm:$0xff] %vm1245_vm1, %v1791_v60  ;;  %v1716_v4 = vpop.permute.xlu0 %1715  ;;  %v1718_v55 = vpop.permute.xlu1 %1717  ;;  %v1543_v31 = vadd.f32 %v1503_v16, %v1291_v10  ;;  %v1545_v14 = vadd.f32 %v1505_v39, %v3449_v42  ;;  %v1507_v28 = vsel %vm1487_vm6, %v3450_v18, %v3452_v3  ;;  %v3453_v53 = vld [vmem:[#allocation85_spill] sm:$0xff] }
 0x4b5   :  { %v1752_v29 = vsel %vm1739_vm7, %v1716_v4, %v1718_v55  ;;  %v1542_v24 = vadd.f32 %v1502_v7, %v1290_v52  ;;  %v1546_v60 = vadd.f32 %v1506_v43, %v3453_v53  ;;  %v1547_v37 = vadd.f32 %v1507_v28, %v3454_v46 }
 0x4b6   :  { %v1792_v13 = vadd.f32 %v1752_v29, %v1540_v58 }
 0x4b8   :  { %1813 = vst [vmem:[%s3229_s3 + $0x60] sm:$0xff] %v1792_v13  ;;  %v1720_v41 = vpop.permute.xlu0 %1719  ;;  %v1722_v9 = vpop.permute.xlu1 %1721 }
 0x4b9   :  { %v1753_v49 = vsel %vm1739_vm7, %v1718_v55, %v1720_v41 }
 0x4ba   :  { %v1793_v32 = vadd.f32 %v1753_v49, %v1541_v6 }
 0x4bc   :  { %1814 = vst.msk [vmem:[%s3229_s3 + $0x68] sm:$0xff] %vm1245_vm1, %v1793_v32  ;;  %v1724_v57 = vpop.permute.xlu0 %1723  ;;  %v1726_v33 = vpop.permute.xlu1 %1725 }
 0x4bd   :  { %v1754_v45 = vsel %vm1739_vm7, %v1722_v9, %v1724_v57  ;;  %v1755_v47 = vsel %vm1739_vm7, %v1724_v57, %v1726_v33 }
 0x4be   :  { %v1794_v30 = vadd.f32 %v1754_v45, %v1542_v24  ;;  %v1795_v17 = vadd.f32 %v1755_v47, %v1543_v31 }
 0x4c0   :  { %1815 = vst [vmem:[%s3229_s3 + $0x70] sm:$0xff] %v1794_v30  ;;  %1816 = vst.msk [vmem:[%s3229_s3 + $0x78] sm:$0xff] %vm1245_vm1, %v1795_v17  ;;  %v1728_v44 = vpop.permute.xlu0 %1727  ;;  %v1730_v8 = vpop.permute.xlu1 %1729 }
 0x4c1   :  { %v1756_v34 = vsel %vm1739_vm7, %v1728_v44, %v1730_v8 }
 0x4c2   :  { %v1796_v51 = vadd.f32 %v1756_v34, %v1544_v50 }
 0x4c4   :  { %1817 = vst [vmem:[%s3229_s3 + $0x80] sm:$0xff] %v1796_v51  ;;  %v1732_v62 = vpop.permute.xlu0 %1731  ;;  %v1734_v0 = vpop.permute.xlu1 %1733 }
 0x4c5   :  { %v1757_v26 = vsel %vm1739_vm7, %v1730_v8, %v1732_v62 }
 0x4c6   :  { %v1797_v23 = vadd.f32 %v1757_v26, %v1545_v14 }
 0x4c8   :  { %1818 = vst.msk [vmem:[%s3229_s3 + $0x88] sm:$0xff] %vm1245_vm1, %v1797_v23  ;;  %v1736_v25 = vpop.permute.xlu0 %1735  ;;  %v1738_v36 = vpop.permute.xlu1 %1737 }
 0x4c9   :  { %v1758_v27 = vsel %vm1739_vm7, %v1734_v0, %v1736_v25  ;;  %v1759_v22 = vsel %vm1739_vm7, %v1736_v25, %v1738_v36 }
 0x4ca   :  { %v1798_v58 = vadd.f32 %v1758_v27, %v1546_v60  ;;  %v1799_v4 = vadd.f32 %v1759_v22, %v1547_v37 }
 0x4cc   :  { %1819 = vst [vmem:[%s3229_s3 + $0x90] sm:$0xf] %v1798_v58  ;;  %1820 = vst.msk [vmem:[%s3229_s3 + $0x98] sm:$0xf] %vm1809_vm8, %v1799_v4 }

</bundles_post_ra>
